<compile_context>
chip_gen: v5e
topology: v5e:2x2
jax: 0.10.0
libtpu: 0.0.40
codegen_flags: <defaults>
</compile_context>

<pallas_src>
import jax
import jax.numpy as jnp
from jax.experimental import pallas as pl
from jax.experimental.pallas import tpu as pltpu

# Static sizes implied by the module (fc1 expects 8*90 = 720 features/sample).
H = 8            # input height
W = 90           # valid input width
WP = 128         # lane-padded width
HID = 60         # fc1 hidden size
HID_PAD = 128    # lane-padded hidden size
KH = KW = 3


def net3_kernel(x_ref, w1_ref, b1_ref, w2_ref, b2_ref, w3_ref, b3_ref,
                fw1_ref, fb1_ref, fw2_ref, fb2_ref, out_ref, flat_ref):
    """One batch tile of Net3.

    x_ref    : VMEM (TM, H, WP)       input, lane-padded with zeros (cols >= W)
    w*_ref   : SMEM (3, 3)            conv kernels (scalar reads)
    b*_ref   : SMEM (1,)              conv biases
    fw1_ref  : VMEM (H*WP, HID_PAD)   fc1 weight, flatten-order matched, zero-padded
    fb1_ref  : VMEM (1, HID_PAD)      fc1 bias (zero-padded)
    fw2_ref  : VMEM (1, HID_PAD)      fc2 weight row (zero-padded)
    fb2_ref  : VMEM (1, 1)            fc2 bias
    out_ref  : VMEM (TM, 1)           output
    flat_ref : VMEM (TM, H*WP)        lane-aligned flatten scratch
    """
    tm = x_ref.shape[0]
    shape = (tm, H, WP)
    row = jax.lax.broadcasted_iota(jnp.int32, shape, 1)
    col = jax.lax.broadcasted_iota(jnp.int32, shape, 2)
    col_ok = col < W

    def conv3x3(xv, w_ref, b_ref):
        # 3x3 'SAME' conv, 1 in / 1 out channel.  Taps built in-register with
        # XLU rolls.  W-direction zero padding comes from the zeroed pad lanes
        # (invariant: cols >= W of the conv input are zero); H-direction zero
        # padding from the row masks (which also kill the sublane wrap-around).
        acc = jnp.zeros_like(xv)
        for di in (-1, 0, 1):
            if di == 0:
                xr = xv
            else:
                xr = pltpu.roll(xv, shift=(-di) % H, axis=1)   # xr[i] = xv[i+di]
                if di == -1:
                    xr = jnp.where(row >= 1, xr, 0.0)
                else:
                    xr = jnp.where(row <= H - 2, xr, 0.0)
            for dj in (-1, 0, 1):
                tap = xr if dj == 0 else pltpu.roll(xr, shift=(-dj) % WP, axis=2)
                acc = acc + w_ref[di + 1, dj + 1] * tap
        return acc + b_ref[0]

    xv = x_ref[...]                                     # pad lanes already zero
    xv = conv3x3(xv, w1_ref, b1_ref)                    # conv1
    xv = jnp.where(col_ok, jnp.maximum(xv, 0.0), 0.0)   # relu + re-zero pad lanes
    xv = conv3x3(xv, w2_ref, b2_ref)                    # conv2
    xv = jnp.where(col_ok, jnp.maximum(xv, 0.0), 0.0)   # relu + re-zero pad lanes
    xv = conv3x3(xv, w3_ref, b3_ref)                    # conv3 (no relu after)
    xv = jnp.where(col_ok, xv, 0.0)                     # zero pad lanes

    # Flatten with lane-aligned, fully dense 128-wide stores.
    for h in range(H):
        flat_ref[:, h * WP:(h + 1) * WP] = xv[:, h, :]

    # fc1: single fused (TM, 1024) @ (1024, 128) MXU matmul; pad rows/cols of
    # the weight are zero so the lane padding contributes nothing.
    h1 = jnp.dot(flat_ref[...], fw1_ref[...], preferred_element_type=jnp.float32)
    h1 = jnp.maximum(h1 + fb1_ref[...], 0.0)

    # fc2 (60 -> 1): VPU multiply + XLU lane reduction instead of a tiny matmul.
    out_ref[...] = jnp.sum(h1 * fw2_ref[...], axis=1, keepdims=True) + fb2_ref[...]


def net3_forward(x_nchw, params, *, tm=None):
    """x_nchw: (N, 1, 8, 90) float32.  Returns (N, 1) float32."""
    (w1, b1, w2, b2, w3, b3, fc1_w, fc1_b, fc2_w, fc2_b) = params
    n, c, h, w = x_nchw.shape
    assert (c, h, w) == (1, H, W)

    f32 = jnp.float32
    if tm is None:
        tm = min(128, ((n + 7) // 8) * 8)      # batch tile (sublane aligned)
    n_pad = ((n + tm - 1) // tm) * tm

    # Lane-pad W to 128 and pad the batch to a multiple of the tile.
    xs = x_nchw.reshape(n, H, W).astype(f32)
    xs = jnp.pad(xs, ((0, n_pad - n), (0, 0), (0, WP - W)))

    # Glue-level parameter reshapes (wrapper-side XLA, no kernel compute).
    w1k = w1.reshape(KH, KW).astype(f32)
    w2k = w2.reshape(KH, KW).astype(f32)
    w3k = w3.reshape(KH, KW).astype(f32)
    b1v = b1.reshape(1).astype(f32)
    b2v = b2.reshape(1).astype(f32)
    b3v = b3.reshape(1).astype(f32)

    # fc1 weight (60, 720) -> 2D lane-dense (H*WP, HID_PAD); feature index in the
    # kernel is h*WP + w, so scatter the real rows (w < 90) and zero the rest.
    fw1 = jnp.zeros((H, WP, HID_PAD), f32)
    fw1 = fw1.at[:, :W, :HID].set(fc1_w.T.reshape(H, W, HID).astype(f32))
    fw1 = fw1.reshape(H * WP, HID_PAD)
    fb1 = jnp.zeros((1, HID_PAD), f32).at[:, :HID].set(fc1_b.reshape(1, HID).astype(f32))
    fw2 = jnp.zeros((1, HID_PAD), f32).at[:, :HID].set(fc2_w.reshape(1, HID).astype(f32))
    fb2 = fc2_b.reshape(1, 1).astype(f32)

    smem = pl.BlockSpec(memory_space=pltpu.MemorySpace.SMEM)

    out = pl.pallas_call(
        net3_kernel,
        out_shape=jax.ShapeDtypeStruct((n_pad, 1), f32),
        grid=(n_pad // tm,),
        in_specs=[pl.BlockSpec((tm, H, WP), lambda i: (i, 0, 0)),   # x (batch tiled)
                  smem, smem,                                       # conv1 w, b
                  smem, smem,                                       # conv2 w, b
                  smem, smem,                                       # conv3 w, b
                  pl.BlockSpec((H * WP, HID_PAD), lambda i: (0, 0)),  # fc1 w (resident)
                  pl.BlockSpec((1, HID_PAD), lambda i: (0, 0)),       # fc1 b
                  pl.BlockSpec((1, HID_PAD), lambda i: (0, 0)),       # fc2 w
                  pl.BlockSpec((1, 1), lambda i: (0, 0))],            # fc2 b
        out_specs=pl.BlockSpec((tm, 1), lambda i: (i, 0)),
        scratch_shapes=[pltpu.VMEM((tm, H * WP), f32)],
        compiler_params=pltpu.CompilerParams(
            dimension_semantics=("parallel",)),
    )(xs, w1k, b1v, w2k, b2v, w3k, b3v, fw1, fb1, fw2, fb2)
    return out[:n]


def init_params(key):
    """Deterministic init mimicking PyTorch default U(-1/sqrt(fan_in), +1/sqrt(fan_in))."""
    ks = jax.random.split(key, 10)

    def u(k, shape, fan_in):
        bound = 1.0 / jnp.sqrt(jnp.float32(fan_in))
        return jax.random.uniform(k, shape, jnp.float32, -bound, bound)

    w1 = u(ks[0], (1, 1, KH, KW), 9);   b1 = u(ks[1], (1,), 9)
    w2 = u(ks[2], (1, 1, KH, KW), 9);   b2 = u(ks[3], (1,), 9)
    w3 = u(ks[4], (1, 1, KH, KW), 9);   b3 = u(ks[5], (1,), 9)
    fc1_w = u(ks[6], (HID, H * W), H * W); fc1_b = u(ks[7], (HID,), H * W)
    fc2_w = u(ks[8], (1, HID), HID);       fc2_b = u(ks[9], (1,), HID)
    return (w1, b1, w2, b2, w3, b3, fc1_w, fc1_b, fc2_w, fc2_b)


def net3_reference(x_nchw, params):
    """Plain-JAX reference of the PyTorch forward (sanity check)."""
    (w1, b1, w2, b2, w3, b3, fc1_w, fc1_b, fc2_w, fc2_b) = params

    def conv(x, wgt, b):
        y = jax.lax.conv_general_dilated(
            x, wgt, window_strides=(1, 1), padding='SAME',
            dimension_numbers=('NCHW', 'OIHW', 'NCHW'))
        return y + b.reshape(1, -1, 1, 1)

    x = conv(x_nchw, w1, b1)
    x = conv(jnp.maximum(x, 0.0), w2, b2)
    x = conv(jnp.maximum(x, 0.0), w3, b3)
    x = x.reshape(-1, H * W)
    x = jnp.maximum(x @ fc1_w.T + fc1_b, 0.0)
    return x @ fc2_w.T + fc2_b


if __name__ == "__main__":
    key = jax.random.PRNGKey(0)
    kx, kp = jax.random.split(key)
    N = 2
    x = jax.random.normal(kx, (N, 1, H, W), dtype=jnp.float32)
    params = init_params(kp)

    out = net3_forward(x, params)
    out = jax.block_until_ready(out)

    ref = net3_reference(x, params)
    assert out.shape == (N, 1)
    assert jnp.allclose(out, ref, atol=2e-3, rtol=2e-3), (out, ref)

    print("KERNEL_OK")
</pallas_src>

<mosaic_0001>
module attributes {stable_mosaic.version = 11 : i64} {
  func.func @net3_kernel(%arg0: i32, %arg1: memref<8x8x128xf32, #tpu.memory_space<vmem>>, %arg2: memref<3x3xf32, #tpu.memory_space<smem>>, %arg3: memref<1xf32, #tpu.memory_space<smem>>, %arg4: memref<3x3xf32, #tpu.memory_space<smem>>, %arg5: memref<1xf32, #tpu.memory_space<smem>>, %arg6: memref<3x3xf32, #tpu.memory_space<smem>>, %arg7: memref<1xf32, #tpu.memory_space<smem>>, %arg8: memref<1024x128xf32, #tpu.memory_space<vmem>>, %arg9: memref<1x128xf32, #tpu.memory_space<vmem>>, %arg10: memref<1x128xf32, #tpu.memory_space<vmem>>, %arg11: memref<1x1xf32, #tpu.memory_space<vmem>>, %arg12: memref<8x1xf32, #tpu.memory_space<vmem>>, %arg13: memref<8x1024xf32, #tpu.memory_space<vmem>>) attributes {dimension_semantics = [#tpu.dimension_semantics<parallel>], iteration_bounds = array<i64: 1>, scalar_prefetch = 0 : i64, scratch_operands = 1 : i64, tpu.core_type = #tpu.core_type<tc>, window_params = [{transform_indices = @transform_0, window_bounds = array<i64: 8, 8, 128>}, {transform_indices = @transform_1, window_bounds = array<i64: 3, 3>}, {transform_indices = @transform_2, window_bounds = array<i64: 1>}, {transform_indices = @transform_3, window_bounds = array<i64: 3, 3>}, {transform_indices = @transform_4, window_bounds = array<i64: 1>}, {transform_indices = @transform_5, window_bounds = array<i64: 3, 3>}, {transform_indices = @transform_6, window_bounds = array<i64: 1>}, {pipeline_mode = #tpu.pipeline_mode<synchronous>, transform_indices = @transform_7, window_bounds = array<i64: 1024, 128>}, {pipeline_mode = #tpu.pipeline_mode<synchronous>, transform_indices = @transform_8, window_bounds = array<i64: 1, 128>}, {pipeline_mode = #tpu.pipeline_mode<synchronous>, transform_indices = @transform_9, window_bounds = array<i64: 1, 128>}, {pipeline_mode = #tpu.pipeline_mode<synchronous>, transform_indices = @transform_10, window_bounds = array<i64: 1, 1>}, {transform_indices = @transform_11, window_bounds = array<i64: 8, 1>}]} {
    %0 = tpu.iota {dimensions = array<i32: 1>} : vector<8x8x128xi32>
    %1 = tpu.iota {dimensions = array<i32: 2>} : vector<8x8x128xi32>
    %c90_i32 = arith.constant 90 : i32
    %2 = vector.broadcast %c90_i32 : i32 to vector<8x8x128xi32>
    %3 = arith.cmpi slt, %1, %2 : vector<8x8x128xi32>
    %c0 = arith.constant 0 : index
    %c0_0 = arith.constant 0 : index
    %c0_1 = arith.constant 0 : index
    %4 = vector.load %arg1[%c0, %c0_0, %c0_1] : memref<8x8x128xf32, #tpu.memory_space<vmem>>, vector<8x8x128xf32>
    %cst = arith.constant 0.000000e+00 : f32
    %5 = vector.broadcast %cst : f32 to vector<8x8x128xf32>
    %c1_i32 = arith.constant 1 : i32
    %6 = tpu.dynamic_rotate %4 by %c1_i32 dim 1 : vector<8x8x128xf32>, i32 -> vector<8x8x128xf32>
    %c1_i32_2 = arith.constant 1 : i32
    %7 = vector.broadcast %c1_i32_2 : i32 to vector<8x8x128xi32>
    %8 = arith.cmpi sge, %0, %7 : vector<8x8x128xi32>
    %cst_3 = arith.constant 0.000000e+00 : f32
    %9 = vector.broadcast %cst_3 : f32 to vector<8x8x128xf32>
    %10 = arith.select %8, %6, %9 : vector<8x8x128xi1>, vector<8x8x128xf32>
    %c1_i32_4 = arith.constant 1 : i32
    %11 = tpu.dynamic_rotate %10 by %c1_i32_4 dim 2 : vector<8x8x128xf32>, i32 -> vector<8x8x128xf32>
    %c0_5 = arith.constant 0 : index
    %c0_6 = arith.constant 0 : index
    %12 = memref.load %arg2[%c0_5, %c0_6] : memref<3x3xf32, #tpu.memory_space<smem>>
    %13 = vector.broadcast %12 : f32 to vector<8x8x128xf32>
    %14 = arith.mulf %13, %11 : vector<8x8x128xf32>
    %15 = arith.addf %5, %14 : vector<8x8x128xf32>
    %c0_7 = arith.constant 0 : index
    %c1 = arith.constant 1 : index
    %16 = memref.load %arg2[%c0_7, %c1] : memref<3x3xf32, #tpu.memory_space<smem>>
    %17 = vector.broadcast %16 : f32 to vector<8x8x128xf32>
    %18 = arith.mulf %17, %10 : vector<8x8x128xf32>
    %19 = arith.addf %15, %18 : vector<8x8x128xf32>
    %c127_i32 = arith.constant 127 : i32
    %20 = tpu.dynamic_rotate %10 by %c127_i32 dim 2 : vector<8x8x128xf32>, i32 -> vector<8x8x128xf32>
    %c0_8 = arith.constant 0 : index
    %c2 = arith.constant 2 : index
    %21 = memref.load %arg2[%c0_8, %c2] : memref<3x3xf32, #tpu.memory_space<smem>>
    %22 = vector.broadcast %21 : f32 to vector<8x8x128xf32>
    %23 = arith.mulf %22, %20 : vector<8x8x128xf32>
    %24 = arith.addf %19, %23 : vector<8x8x128xf32>
    %c1_i32_9 = arith.constant 1 : i32
    %25 = tpu.dynamic_rotate %4 by %c1_i32_9 dim 2 : vector<8x8x128xf32>, i32 -> vector<8x8x128xf32>
    %c1_10 = arith.constant 1 : index
    %c0_11 = arith.constant 0 : index
    %26 = memref.load %arg2[%c1_10, %c0_11] : memref<3x3xf32, #tpu.memory_space<smem>>
    %27 = vector.broadcast %26 : f32 to vector<8x8x128xf32>
    %28 = arith.mulf %27, %25 : vector<8x8x128xf32>
    %29 = arith.addf %24, %28 : vector<8x8x128xf32>
    %c1_12 = arith.constant 1 : index
    %c1_13 = arith.constant 1 : index
    %30 = memref.load %arg2[%c1_12, %c1_13] : memref<3x3xf32, #tpu.memory_space<smem>>
    %31 = vector.broadcast %30 : f32 to vector<8x8x128xf32>
    %32 = arith.mulf %31, %4 : vector<8x8x128xf32>
    %33 = arith.addf %29, %32 : vector<8x8x128xf32>
    %c127_i32_14 = arith.constant 127 : i32
    %34 = tpu.dynamic_rotate %4 by %c127_i32_14 dim 2 : vector<8x8x128xf32>, i32 -> vector<8x8x128xf32>
    %c1_15 = arith.constant 1 : index
    %c2_16 = arith.constant 2 : index
    %35 = memref.load %arg2[%c1_15, %c2_16] : memref<3x3xf32, #tpu.memory_space<smem>>
    %36 = vector.broadcast %35 : f32 to vector<8x8x128xf32>
    %37 = arith.mulf %36, %34 : vector<8x8x128xf32>
    %38 = arith.addf %33, %37 : vector<8x8x128xf32>
    %c7_i32 = arith.constant 7 : i32
    %39 = tpu.dynamic_rotate %4 by %c7_i32 dim 1 : vector<8x8x128xf32>, i32 -> vector<8x8x128xf32>
    %c6_i32 = arith.constant 6 : i32
    %40 = vector.broadcast %c6_i32 : i32 to vector<8x8x128xi32>
    %41 = arith.cmpi sle, %0, %40 : vector<8x8x128xi32>
    %cst_17 = arith.constant 0.000000e+00 : f32
    %42 = vector.broadcast %cst_17 : f32 to vector<8x8x128xf32>
    %43 = arith.select %41, %39, %42 : vector<8x8x128xi1>, vector<8x8x128xf32>
    %c1_i32_18 = arith.constant 1 : i32
    %44 = tpu.dynamic_rotate %43 by %c1_i32_18 dim 2 : vector<8x8x128xf32>, i32 -> vector<8x8x128xf32>
    %c2_19 = arith.constant 2 : index
    %c0_20 = arith.constant 0 : index
    %45 = memref.load %arg2[%c2_19, %c0_20] : memref<3x3xf32, #tpu.memory_space<smem>>
    %46 = vector.broadcast %45 : f32 to vector<8x8x128xf32>
    %47 = arith.mulf %46, %44 : vector<8x8x128xf32>
    %48 = arith.addf %38, %47 : vector<8x8x128xf32>
    %c2_21 = arith.constant 2 : index
    %c1_22 = arith.constant 1 : index
    %49 = memref.load %arg2[%c2_21, %c1_22] : memref<3x3xf32, #tpu.memory_space<smem>>
    %50 = vector.broadcast %49 : f32 to vector<8x8x128xf32>
    %51 = arith.mulf %50, %43 : vector<8x8x128xf32>
    %52 = arith.addf %48, %51 : vector<8x8x128xf32>
    %c127_i32_23 = arith.constant 127 : i32
    %53 = tpu.dynamic_rotate %43 by %c127_i32_23 dim 2 : vector<8x8x128xf32>, i32 -> vector<8x8x128xf32>
    %c2_24 = arith.constant 2 : index
    %c2_25 = arith.constant 2 : index
    %54 = memref.load %arg2[%c2_24, %c2_25] : memref<3x3xf32, #tpu.memory_space<smem>>
    %55 = vector.broadcast %54 : f32 to vector<8x8x128xf32>
    %56 = arith.mulf %55, %53 : vector<8x8x128xf32>
    %57 = arith.addf %52, %56 : vector<8x8x128xf32>
    %c0_26 = arith.constant 0 : index
    %58 = memref.load %arg3[%c0_26] : memref<1xf32, #tpu.memory_space<smem>>
    %59 = vector.broadcast %58 : f32 to vector<8x8x128xf32>
    %60 = arith.addf %57, %59 : vector<8x8x128xf32>
    %cst_27 = arith.constant 0.000000e+00 : f32
    %61 = vector.broadcast %cst_27 : f32 to vector<8x8x128xf32>
    %62 = arith.maximumf %60, %61 : vector<8x8x128xf32>
    %cst_28 = arith.constant 0.000000e+00 : f32
    %63 = vector.broadcast %cst_28 : f32 to vector<8x8x128xf32>
    %64 = arith.select %3, %62, %63 : vector<8x8x128xi1>, vector<8x8x128xf32>
    %cst_29 = arith.constant 0.000000e+00 : f32
    %65 = vector.broadcast %cst_29 : f32 to vector<8x8x128xf32>
    %c1_i32_30 = arith.constant 1 : i32
    %66 = tpu.dynamic_rotate %64 by %c1_i32_30 dim 1 : vector<8x8x128xf32>, i32 -> vector<8x8x128xf32>
    %c1_i32_31 = arith.constant 1 : i32
    %67 = vector.broadcast %c1_i32_31 : i32 to vector<8x8x128xi32>
    %68 = arith.cmpi sge, %0, %67 : vector<8x8x128xi32>
    %cst_32 = arith.constant 0.000000e+00 : f32
    %69 = vector.broadcast %cst_32 : f32 to vector<8x8x128xf32>
    %70 = arith.select %68, %66, %69 : vector<8x8x128xi1>, vector<8x8x128xf32>
    %c1_i32_33 = arith.constant 1 : i32
    %71 = tpu.dynamic_rotate %70 by %c1_i32_33 dim 2 : vector<8x8x128xf32>, i32 -> vector<8x8x128xf32>
    %c0_34 = arith.constant 0 : index
    %c0_35 = arith.constant 0 : index
    %72 = memref.load %arg4[%c0_34, %c0_35] : memref<3x3xf32, #tpu.memory_space<smem>>
    %73 = vector.broadcast %72 : f32 to vector<8x8x128xf32>
    %74 = arith.mulf %73, %71 : vector<8x8x128xf32>
    %75 = arith.addf %65, %74 : vector<8x8x128xf32>
    %c0_36 = arith.constant 0 : index
    %c1_37 = arith.constant 1 : index
    %76 = memref.load %arg4[%c0_36, %c1_37] : memref<3x3xf32, #tpu.memory_space<smem>>
    %77 = vector.broadcast %76 : f32 to vector<8x8x128xf32>
    %78 = arith.mulf %77, %70 : vector<8x8x128xf32>
    %79 = arith.addf %75, %78 : vector<8x8x128xf32>
    %c127_i32_38 = arith.constant 127 : i32
    %80 = tpu.dynamic_rotate %70 by %c127_i32_38 dim 2 : vector<8x8x128xf32>, i32 -> vector<8x8x128xf32>
    %c0_39 = arith.constant 0 : index
    %c2_40 = arith.constant 2 : index
    %81 = memref.load %arg4[%c0_39, %c2_40] : memref<3x3xf32, #tpu.memory_space<smem>>
    %82 = vector.broadcast %81 : f32 to vector<8x8x128xf32>
    %83 = arith.mulf %82, %80 : vector<8x8x128xf32>
    %84 = arith.addf %79, %83 : vector<8x8x128xf32>
    %c1_i32_41 = arith.constant 1 : i32
    %85 = tpu.dynamic_rotate %64 by %c1_i32_41 dim 2 : vector<8x8x128xf32>, i32 -> vector<8x8x128xf32>
    %c1_42 = arith.constant 1 : index
    %c0_43 = arith.constant 0 : index
    %86 = memref.load %arg4[%c1_42, %c0_43] : memref<3x3xf32, #tpu.memory_space<smem>>
    %87 = vector.broadcast %86 : f32 to vector<8x8x128xf32>
    %88 = arith.mulf %87, %85 : vector<8x8x128xf32>
    %89 = arith.addf %84, %88 : vector<8x8x128xf32>
    %c1_44 = arith.constant 1 : index
    %c1_45 = arith.constant 1 : index
    %90 = memref.load %arg4[%c1_44, %c1_45] : memref<3x3xf32, #tpu.memory_space<smem>>
    %91 = vector.broadcast %90 : f32 to vector<8x8x128xf32>
    %92 = arith.mulf %91, %64 : vector<8x8x128xf32>
    %93 = arith.addf %89, %92 : vector<8x8x128xf32>
    %c127_i32_46 = arith.constant 127 : i32
    %94 = tpu.dynamic_rotate %64 by %c127_i32_46 dim 2 : vector<8x8x128xf32>, i32 -> vector<8x8x128xf32>
    %c1_47 = arith.constant 1 : index
    %c2_48 = arith.constant 2 : index
    %95 = memref.load %arg4[%c1_47, %c2_48] : memref<3x3xf32, #tpu.memory_space<smem>>
    %96 = vector.broadcast %95 : f32 to vector<8x8x128xf32>
    %97 = arith.mulf %96, %94 : vector<8x8x128xf32>
    %98 = arith.addf %93, %97 : vector<8x8x128xf32>
    %c7_i32_49 = arith.constant 7 : i32
    %99 = tpu.dynamic_rotate %64 by %c7_i32_49 dim 1 : vector<8x8x128xf32>, i32 -> vector<8x8x128xf32>
    %c6_i32_50 = arith.constant 6 : i32
    %100 = vector.broadcast %c6_i32_50 : i32 to vector<8x8x128xi32>
    %101 = arith.cmpi sle, %0, %100 : vector<8x8x128xi32>
    %cst_51 = arith.constant 0.000000e+00 : f32
    %102 = vector.broadcast %cst_51 : f32 to vector<8x8x128xf32>
    %103 = arith.select %101, %99, %102 : vector<8x8x128xi1>, vector<8x8x128xf32>
    %c1_i32_52 = arith.constant 1 : i32
    %104 = tpu.dynamic_rotate %103 by %c1_i32_52 dim 2 : vector<8x8x128xf32>, i32 -> vector<8x8x128xf32>
    %c2_53 = arith.constant 2 : index
    %c0_54 = arith.constant 0 : index
    %105 = memref.load %arg4[%c2_53, %c0_54] : memref<3x3xf32, #tpu.memory_space<smem>>
    %106 = vector.broadcast %105 : f32 to vector<8x8x128xf32>
    %107 = arith.mulf %106, %104 : vector<8x8x128xf32>
    %108 = arith.addf %98, %107 : vector<8x8x128xf32>
    %c2_55 = arith.constant 2 : index
    %c1_56 = arith.constant 1 : index
    %109 = memref.load %arg4[%c2_55, %c1_56] : memref<3x3xf32, #tpu.memory_space<smem>>
    %110 = vector.broadcast %109 : f32 to vector<8x8x128xf32>
    %111 = arith.mulf %110, %103 : vector<8x8x128xf32>
    %112 = arith.addf %108, %111 : vector<8x8x128xf32>
    %c127_i32_57 = arith.constant 127 : i32
    %113 = tpu.dynamic_rotate %103 by %c127_i32_57 dim 2 : vector<8x8x128xf32>, i32 -> vector<8x8x128xf32>
    %c2_58 = arith.constant 2 : index
    %c2_59 = arith.constant 2 : index
    %114 = memref.load %arg4[%c2_58, %c2_59] : memref<3x3xf32, #tpu.memory_space<smem>>
    %115 = vector.broadcast %114 : f32 to vector<8x8x128xf32>
    %116 = arith.mulf %115, %113 : vector<8x8x128xf32>
    %117 = arith.addf %112, %116 : vector<8x8x128xf32>
    %c0_60 = arith.constant 0 : index
    %118 = memref.load %arg5[%c0_60] : memref<1xf32, #tpu.memory_space<smem>>
    %119 = vector.broadcast %118 : f32 to vector<8x8x128xf32>
    %120 = arith.addf %117, %119 : vector<8x8x128xf32>
    %cst_61 = arith.constant 0.000000e+00 : f32
    %121 = vector.broadcast %cst_61 : f32 to vector<8x8x128xf32>
    %122 = arith.maximumf %120, %121 : vector<8x8x128xf32>
    %cst_62 = arith.constant 0.000000e+00 : f32
    %123 = vector.broadcast %cst_62 : f32 to vector<8x8x128xf32>
    %124 = arith.select %3, %122, %123 : vector<8x8x128xi1>, vector<8x8x128xf32>
    %cst_63 = arith.constant 0.000000e+00 : f32
    %125 = vector.broadcast %cst_63 : f32 to vector<8x8x128xf32>
    %c1_i32_64 = arith.constant 1 : i32
    %126 = tpu.dynamic_rotate %124 by %c1_i32_64 dim 1 : vector<8x8x128xf32>, i32 -> vector<8x8x128xf32>
    %c1_i32_65 = arith.constant 1 : i32
    %127 = vector.broadcast %c1_i32_65 : i32 to vector<8x8x128xi32>
    %128 = arith.cmpi sge, %0, %127 : vector<8x8x128xi32>
    %cst_66 = arith.constant 0.000000e+00 : f32
    %129 = vector.broadcast %cst_66 : f32 to vector<8x8x128xf32>
    %130 = arith.select %128, %126, %129 : vector<8x8x128xi1>, vector<8x8x128xf32>
    %c1_i32_67 = arith.constant 1 : i32
    %131 = tpu.dynamic_rotate %130 by %c1_i32_67 dim 2 : vector<8x8x128xf32>, i32 -> vector<8x8x128xf32>
    %c0_68 = arith.constant 0 : index
    %c0_69 = arith.constant 0 : index
    %132 = memref.load %arg6[%c0_68, %c0_69] : memref<3x3xf32, #tpu.memory_space<smem>>
    %133 = vector.broadcast %132 : f32 to vector<8x8x128xf32>
    %134 = arith.mulf %133, %131 : vector<8x8x128xf32>
    %135 = arith.addf %125, %134 : vector<8x8x128xf32>
    %c0_70 = arith.constant 0 : index
    %c1_71 = arith.constant 1 : index
    %136 = memref.load %arg6[%c0_70, %c1_71] : memref<3x3xf32, #tpu.memory_space<smem>>
    %137 = vector.broadcast %136 : f32 to vector<8x8x128xf32>
    %138 = arith.mulf %137, %130 : vector<8x8x128xf32>
    %139 = arith.addf %135, %138 : vector<8x8x128xf32>
    %c127_i32_72 = arith.constant 127 : i32
    %140 = tpu.dynamic_rotate %130 by %c127_i32_72 dim 2 : vector<8x8x128xf32>, i32 -> vector<8x8x128xf32>
    %c0_73 = arith.constant 0 : index
    %c2_74 = arith.constant 2 : index
    %141 = memref.load %arg6[%c0_73, %c2_74] : memref<3x3xf32, #tpu.memory_space<smem>>
    %142 = vector.broadcast %141 : f32 to vector<8x8x128xf32>
    %143 = arith.mulf %142, %140 : vector<8x8x128xf32>
    %144 = arith.addf %139, %143 : vector<8x8x128xf32>
    %c1_i32_75 = arith.constant 1 : i32
    %145 = tpu.dynamic_rotate %124 by %c1_i32_75 dim 2 : vector<8x8x128xf32>, i32 -> vector<8x8x128xf32>
    %c1_76 = arith.constant 1 : index
    %c0_77 = arith.constant 0 : index
    %146 = memref.load %arg6[%c1_76, %c0_77] : memref<3x3xf32, #tpu.memory_space<smem>>
    %147 = vector.broadcast %146 : f32 to vector<8x8x128xf32>
    %148 = arith.mulf %147, %145 : vector<8x8x128xf32>
    %149 = arith.addf %144, %148 : vector<8x8x128xf32>
    %c1_78 = arith.constant 1 : index
    %c1_79 = arith.constant 1 : index
    %150 = memref.load %arg6[%c1_78, %c1_79] : memref<3x3xf32, #tpu.memory_space<smem>>
    %151 = vector.broadcast %150 : f32 to vector<8x8x128xf32>
    %152 = arith.mulf %151, %124 : vector<8x8x128xf32>
    %153 = arith.addf %149, %152 : vector<8x8x128xf32>
    %c127_i32_80 = arith.constant 127 : i32
    %154 = tpu.dynamic_rotate %124 by %c127_i32_80 dim 2 : vector<8x8x128xf32>, i32 -> vector<8x8x128xf32>
    %c1_81 = arith.constant 1 : index
    %c2_82 = arith.constant 2 : index
    %155 = memref.load %arg6[%c1_81, %c2_82] : memref<3x3xf32, #tpu.memory_space<smem>>
    %156 = vector.broadcast %155 : f32 to vector<8x8x128xf32>
    %157 = arith.mulf %156, %154 : vector<8x8x128xf32>
    %158 = arith.addf %153, %157 : vector<8x8x128xf32>
    %c7_i32_83 = arith.constant 7 : i32
    %159 = tpu.dynamic_rotate %124 by %c7_i32_83 dim 1 : vector<8x8x128xf32>, i32 -> vector<8x8x128xf32>
    %c6_i32_84 = arith.constant 6 : i32
    %160 = vector.broadcast %c6_i32_84 : i32 to vector<8x8x128xi32>
    %161 = arith.cmpi sle, %0, %160 : vector<8x8x128xi32>
    %cst_85 = arith.constant 0.000000e+00 : f32
    %162 = vector.broadcast %cst_85 : f32 to vector<8x8x128xf32>
    %163 = arith.select %161, %159, %162 : vector<8x8x128xi1>, vector<8x8x128xf32>
    %c1_i32_86 = arith.constant 1 : i32
    %164 = tpu.dynamic_rotate %163 by %c1_i32_86 dim 2 : vector<8x8x128xf32>, i32 -> vector<8x8x128xf32>
    %c2_87 = arith.constant 2 : index
    %c0_88 = arith.constant 0 : index
    %165 = memref.load %arg6[%c2_87, %c0_88] : memref<3x3xf32, #tpu.memory_space<smem>>
    %166 = vector.broadcast %165 : f32 to vector<8x8x128xf32>
    %167 = arith.mulf %166, %164 : vector<8x8x128xf32>
    %168 = arith.addf %158, %167 : vector<8x8x128xf32>
    %c2_89 = arith.constant 2 : index
    %c1_90 = arith.constant 1 : index
    %169 = memref.load %arg6[%c2_89, %c1_90] : memref<3x3xf32, #tpu.memory_space<smem>>
    %170 = vector.broadcast %169 : f32 to vector<8x8x128xf32>
    %171 = arith.mulf %170, %163 : vector<8x8x128xf32>
    %172 = arith.addf %168, %171 : vector<8x8x128xf32>
    %c127_i32_91 = arith.constant 127 : i32
    %173 = tpu.dynamic_rotate %163 by %c127_i32_91 dim 2 : vector<8x8x128xf32>, i32 -> vector<8x8x128xf32>
    %c2_92 = arith.constant 2 : index
    %c2_93 = arith.constant 2 : index
    %174 = memref.load %arg6[%c2_92, %c2_93] : memref<3x3xf32, #tpu.memory_space<smem>>
    %175 = vector.broadcast %174 : f32 to vector<8x8x128xf32>
    %176 = arith.mulf %175, %173 : vector<8x8x128xf32>
    %177 = arith.addf %172, %176 : vector<8x8x128xf32>
    %c0_94 = arith.constant 0 : index
    %178 = memref.load %arg7[%c0_94] : memref<1xf32, #tpu.memory_space<smem>>
    %179 = vector.broadcast %178 : f32 to vector<8x8x128xf32>
    %180 = arith.addf %177, %179 : vector<8x8x128xf32>
    %cst_95 = arith.constant 0.000000e+00 : f32
    %181 = vector.broadcast %cst_95 : f32 to vector<8x8x128xf32>
    %182 = arith.select %3, %180, %181 : vector<8x8x128xi1>, vector<8x8x128xf32>
    %183 = vector.extract_strided_slice %182 {offsets = [0, 0, 0], sizes = [8, 1, 128], strides = [1, 1, 1]} : vector<8x8x128xf32> to vector<8x1x128xf32>
    %184 = vector.shape_cast %183 : vector<8x1x128xf32> to vector<8x128xf32>
    %c0_96 = arith.constant 0 : index
    %c0_97 = arith.constant 0 : index
    %185 = vector.load %arg13[%c0_96, %c0_97] : memref<8x1024xf32, #tpu.memory_space<vmem>>, vector<8x128xf32>
    tpu.vector_store %arg13[%c0_96, %c0_97], %184 {strides = array<i32>} : memref<8x1024xf32, #tpu.memory_space<vmem>>, vector<8x128xf32>,
    %186 = vector.extract_strided_slice %182 {offsets = [0, 1, 0], sizes = [8, 1, 128], strides = [1, 1, 1]} : vector<8x8x128xf32> to vector<8x1x128xf32>
    %187 = vector.shape_cast %186 : vector<8x1x128xf32> to vector<8x128xf32>
    %c0_98 = arith.constant 0 : index
    %c128 = arith.constant 128 : index
    %188 = vector.load %arg13[%c0_98, %c128] : memref<8x1024xf32, #tpu.memory_space<vmem>>, vector<8x128xf32>
    tpu.vector_store %arg13[%c0_98, %c128], %187 {strides = array<i32>} : memref<8x1024xf32, #tpu.memory_space<vmem>>, vector<8x128xf32>,
    %189 = vector.extract_strided_slice %182 {offsets = [0, 2, 0], sizes = [8, 1, 128], strides = [1, 1, 1]} : vector<8x8x128xf32> to vector<8x1x128xf32>
    %190 = vector.shape_cast %189 : vector<8x1x128xf32> to vector<8x128xf32>
    %c0_99 = arith.constant 0 : index
    %c256 = arith.constant 256 : index
    %191 = vector.load %arg13[%c0_99, %c256] : memref<8x1024xf32, #tpu.memory_space<vmem>>, vector<8x128xf32>
    tpu.vector_store %arg13[%c0_99, %c256], %190 {strides = array<i32>} : memref<8x1024xf32, #tpu.memory_space<vmem>>, vector<8x128xf32>,
    %192 = vector.extract_strided_slice %182 {offsets = [0, 3, 0], sizes = [8, 1, 128], strides = [1, 1, 1]} : vector<8x8x128xf32> to vector<8x1x128xf32>
    %193 = vector.shape_cast %192 : vector<8x1x128xf32> to vector<8x128xf32>
    %c0_100 = arith.constant 0 : index
    %c384 = arith.constant 384 : index
    %194 = vector.load %arg13[%c0_100, %c384] : memref<8x1024xf32, #tpu.memory_space<vmem>>, vector<8x128xf32>
    tpu.vector_store %arg13[%c0_100, %c384], %193 {strides = array<i32>} : memref<8x1024xf32, #tpu.memory_space<vmem>>, vector<8x128xf32>,
    %195 = vector.extract_strided_slice %182 {offsets = [0, 4, 0], sizes = [8, 1, 128], strides = [1, 1, 1]} : vector<8x8x128xf32> to vector<8x1x128xf32>
    %196 = vector.shape_cast %195 : vector<8x1x128xf32> to vector<8x128xf32>
    %c0_101 = arith.constant 0 : index
    %c512 = arith.constant 512 : index
    %197 = vector.load %arg13[%c0_101, %c512] : memref<8x1024xf32, #tpu.memory_space<vmem>>, vector<8x128xf32>
    tpu.vector_store %arg13[%c0_101, %c512], %196 {strides = array<i32>} : memref<8x1024xf32, #tpu.memory_space<vmem>>, vector<8x128xf32>,
    %198 = vector.extract_strided_slice %182 {offsets = [0, 5, 0], sizes = [8, 1, 128], strides = [1, 1, 1]} : vector<8x8x128xf32> to vector<8x1x128xf32>
    %199 = vector.shape_cast %198 : vector<8x1x128xf32> to vector<8x128xf32>
    %c0_102 = arith.constant 0 : index
    %c640 = arith.constant 640 : index
    %200 = vector.load %arg13[%c0_102, %c640] : memref<8x1024xf32, #tpu.memory_space<vmem>>, vector<8x128xf32>
    tpu.vector_store %arg13[%c0_102, %c640], %199 {strides = array<i32>} : memref<8x1024xf32, #tpu.memory_space<vmem>>, vector<8x128xf32>,
    %201 = vector.extract_strided_slice %182 {offsets = [0, 6, 0], sizes = [8, 1, 128], strides = [1, 1, 1]} : vector<8x8x128xf32> to vector<8x1x128xf32>
    %202 = vector.shape_cast %201 : vector<8x1x128xf32> to vector<8x128xf32>
    %c0_103 = arith.constant 0 : index
    %c768 = arith.constant 768 : index
    %203 = vector.load %arg13[%c0_103, %c768] : memref<8x1024xf32, #tpu.memory_space<vmem>>, vector<8x128xf32>
    tpu.vector_store %arg13[%c0_103, %c768], %202 {strides = array<i32>} : memref<8x1024xf32, #tpu.memory_space<vmem>>, vector<8x128xf32>,
    %204 = vector.extract_strided_slice %182 {offsets = [0, 7, 0], sizes = [8, 1, 128], strides = [1, 1, 1]} : vector<8x8x128xf32> to vector<8x1x128xf32>
    %205 = vector.shape_cast %204 : vector<8x1x128xf32> to vector<8x128xf32>
    %c0_104 = arith.constant 0 : index
    %c896 = arith.constant 896 : index
    %206 = vector.load %arg13[%c0_104, %c896] : memref<8x1024xf32, #tpu.memory_space<vmem>>, vector<8x128xf32>
    tpu.vector_store %arg13[%c0_104, %c896], %205 {strides = array<i32>} : memref<8x1024xf32, #tpu.memory_space<vmem>>, vector<8x128xf32>,
    %c0_105 = arith.constant 0 : index
    %c0_106 = arith.constant 0 : index
    %207 = vector.load %arg13[%c0_105, %c0_106] : memref<8x1024xf32, #tpu.memory_space<vmem>>, vector<8x1024xf32>
    %c0_107 = arith.constant 0 : index
    %c0_108 = arith.constant 0 : index
    %208 = vector.load %arg8[%c0_107, %c0_108] : memref<1024x128xf32, #tpu.memory_space<vmem>>, vector<1024x128xf32>
    %cst_109 = arith.constant dense<0.000000e+00> : vector<8x128xf32>
    %209 = tpu.matmul %207, %208, %cst_109 {dimension_numbers = #tpu.dot_dimension_numbers<[1], [0], [0], [1], [0, 0, 1, 1], [], []>} : vector<8x1024xf32>, vector<1024x128xf32>, vector<8x128xf32> -> vector<8x128xf32>
    %c0_110 = arith.constant 0 : index
    %c0_111 = arith.constant 0 : index
    %210 = vector.load %arg9[%c0_110, %c0_111] : memref<1x128xf32, #tpu.memory_space<vmem>>, vector<1x128xf32>
    %211 = vector.broadcast %210 : vector<1x128xf32> to vector<8x128xf32>
    %212 = arith.addf %209, %211 : vector<8x128xf32>
    %cst_112 = arith.constant 0.000000e+00 : f32
    %213 = vector.broadcast %cst_112 : f32 to vector<8x128xf32>
    %214 = arith.maximumf %212, %213 : vector<8x128xf32>
    %c0_113 = arith.constant 0 : index
    %c0_114 = arith.constant 0 : index
    %215 = vector.load %arg10[%c0_113, %c0_114] : memref<1x128xf32, #tpu.memory_space<vmem>>, vector<1x128xf32>
    %216 = vector.broadcast %215 : vector<1x128xf32> to vector<8x128xf32>
    %217 = arith.mulf %214, %216 : vector<8x128xf32>
    %cst_115 = arith.constant dense<0.000000e+00> : vector<8xf32>
    %218 = vector.multi_reduction <add>, %217, %cst_115 [1] : vector<8x128xf32> to vector<8xf32>
    %219 = vector.shape_cast %218 : vector<8xf32> to vector<8x1xf32>
    %c0_116 = arith.constant 0 : index
    %c0_117 = arith.constant 0 : index
    %220 = vector.load %arg11[%c0_116, %c0_117] : memref<1x1xf32, #tpu.memory_space<vmem>>, vector<1x1xf32>
    %221 = vector.broadcast %220 : vector<1x1xf32> to vector<8x1xf32>
    %222 = arith.addf %219, %221 : vector<8x1xf32>
    %c0_118 = arith.constant 0 : index
    %c0_119 = arith.constant 0 : index
    %223 = vector.load %arg12[%c0_118, %c0_119] : memref<8x1xf32, #tpu.memory_space<vmem>>, vector<8x1xf32>
    tpu.vector_store %arg12[%c0_118, %c0_119], %222 {strides = array<i32>} : memref<8x1xf32, #tpu.memory_space<vmem>>, vector<8x1xf32>,
    return
  }
  func.func @transform_0(%arg0: i32) -> (i32, i32, i32) {
    %c0_i32 = arith.constant 0 : i32
    %c0_i32_0 = arith.constant 0 : i32
    %c0_i32_1 = arith.constant 0 : i32
    return %arg0, %c0_i32, %c0_i32_0 : i32, i32, i32
  }
  func.func @transform_1(%arg0: i32) -> (i32, i32) {
    %c0_i32 = arith.constant 0 : i32
    %c0_i32_0 = arith.constant 0 : i32
    %c0_i32_1 = arith.constant 0 : i32
    return %c0_i32, %c0_i32_0 : i32, i32
  }
  func.func @transform_2(%arg0: i32) -> i32 {
    %c0_i32 = arith.constant 0 : i32
    %c0_i32_0 = arith.constant 0 : i32
    return %c0_i32 : i32
  }
  func.func @transform_3(%arg0: i32) -> (i32, i32) {
    %c0_i32 = arith.constant 0 : i32
    %c0_i32_0 = arith.constant 0 : i32
    %c0_i32_1 = arith.constant 0 : i32
    return %c0_i32, %c0_i32_0 : i32, i32
  }
  func.func @transform_4(%arg0: i32) -> i32 {
    %c0_i32 = arith.constant 0 : i32
    %c0_i32_0 = arith.constant 0 : i32
    return %c0_i32 : i32
  }
  func.func @transform_5(%arg0: i32) -> (i32, i32) {
    %c0_i32 = arith.constant 0 : i32
    %c0_i32_0 = arith.constant 0 : i32
    %c0_i32_1 = arith.constant 0 : i32
    return %c0_i32, %c0_i32_0 : i32, i32
  }
  func.func @transform_6(%arg0: i32) -> i32 {
    %c0_i32 = arith.constant 0 : i32
    %c0_i32_0 = arith.constant 0 : i32
    return %c0_i32 : i32
  }
  func.func @transform_7(%arg0: i32) -> (i32, i32) {
    %c0_i32 = arith.constant 0 : i32
    %c0_i32_0 = arith.constant 0 : i32
    %c0_i32_1 = arith.constant 0 : i32
    return %c0_i32, %c0_i32_0 : i32, i32
  }
  func.func @transform_8(%arg0: i32) -> (i32, i32) {
    %c0_i32 = arith.constant 0 : i32
    %c0_i32_0 = arith.constant 0 : i32
    %c0_i32_1 = arith.constant 0 : i32
    return %c0_i32, %c0_i32_0 : i32, i32
  }
  func.func @transform_9(%arg0: i32) -> (i32, i32) {
    %c0_i32 = arith.constant 0 : i32
    %c0_i32_0 = arith.constant 0 : i32
    %c0_i32_1 = arith.constant 0 : i32
    return %c0_i32, %c0_i32_0 : i32, i32
  }
  func.func @transform_10(%arg0: i32) -> (i32, i32) {
    %c0_i32 = arith.constant 0 : i32
    %c0_i32_0 = arith.constant 0 : i32
    %c0_i32_1 = arith.constant 0 : i32
    return %c0_i32, %c0_i32_0 : i32, i32
  }
  func.func @transform_11(%arg0: i32) -> (i32, i32) {
    %c0_i32 = arith.constant 0 : i32
    %c0_i32_0 = arith.constant 0 : i32
    return %arg0, %c0_i32 : i32, i32
  }
}

</mosaic_0001>

<bundles_post_ra>
// kernel: tpu_custom_call.1
= control target key start
LH: loop header
LB: loop body
LE: loop exit
PB: predicated region body
PF: predicated region fallthrough
CT: control target
= control target key end

     0   :  { %s3098_s0 = inlined_call_operand.hbm [shape: f32[8,8,128], index: 0, kind: input, shape index: {}]   ;;  %s3099_s1 = inlined_call_operand.vmem [shape: f32[3,3], index: 1, kind: input, shape index: {}]   ;;  %s3100_s2 = inlined_call_operand.<no memory space> [shape: f32[1], index: 2, kind: input, shape index: {}]   ;;  %s3101_s3 = inlined_call_operand.vmem [shape: f32[3,3], index: 3, kind: input, shape index: {}]   ;;  %s3102_s4 = inlined_call_operand.<no memory space> [shape: f32[1], index: 4, kind: input, shape index: {}]   ;;  %s3103_s5 = inlined_call_operand.hbm [shape: f32[3,3], index: 5, kind: input, shape index: {}]   ;;  %s3104_s6 = inlined_call_operand.<no memory space> [shape: f32[1], index: 6, kind: input, shape index: {}]   ;;  %s3105_s7 = inlined_call_operand.hbm [shape: f32[1024,128], index: 7, kind: input, shape index: {}]   ;;  %s3106_s8 = inlined_call_operand.vmem [shape: f32[1,128], index: 8, kind: input, shape index: {}]   ;;  %s3107_s9 = inlined_call_operand.vmem [shape: f32[1,128], index: 9, kind: input, shape index: {}]   ;;  %s3108_s10 = inlined_call_operand.<no memory space> [shape: f32[1,1], index: 10, kind: input, shape index: {}]   ;;  %s3109_s11 = inlined_call_operand.vmem [shape: f32[8,1], index: 11, kind: output, shape index: {}]  }
   0x1   :  { %v19_v0 = vstv %s3108_s10 }
   0x2   :  { %20 = vst [vmem:[#allocation6] sm:$0x1] %v19_v0 }
   0x3   :  { %21 = vsyncpa [#allocation8], 0 }
   0x4   :  { %22 = vsyncpa [#allocation10], 0 }
   0x5   :  { %23 = vsyncpa [#allocation13], 0 }
   0x6   :  { %24 = vsyncpa [#allocation9], 0  ;;  %s30_s21 = sshll.u32 %s3098_s0, 4  ;;  %s31_s21 = int_to_ptr.hbm [resolvable:$true] %s30_s21 }
   0x7   :  { %25 = vsyncpa [#allocation16], 0  ;;  %s1664_s22 = smov [#allocation7]   ;;  %s44_s26 = sshll.u32 %s3099_s1, 4  ;;  %s45_s26 = int_to_ptr.vmem [resolvable:$true] %s44_s26 }
   0x8   :  { %s32_s23 = sshll.u32 %s1664_s22, 4  ;;  %s1665_s27 = smov 128   ;;  %s33_s23 = int_to_ptr.vmem [resolvable:$true] %s32_s23 }
   0x9   :  { %s1666_s10 = smov 8   ;;  %s1667_s28 = smov [#allocation11]  }
   0xa   :  { %38 = dma.hbm_to_vmem [thread:$0]  %s31_s21, 1024, %s33_s23, [#allocation8], %s1665_s27, %s1665_s27, %s1666_s10  }
   0xb   :  { %47 = dma.vmem_to_smem %s45_s26, 64, %s1667_s28, [#allocation10]  }
   0xc   :  { %s55_s12 = sshll.u32 %s3101_s3, 4  ;;  %s66_s14 = sshll.u32 %s3103_s5, 4  ;;  %s56_s12 = int_to_ptr.vmem [resolvable:$true] %s55_s12  ;;  %s67_s14 = int_to_ptr.hbm [resolvable:$true] %s66_s14 }
   0xd   :  { %s1668_s15 = smov [#allocation12]   ;;  %s1669_s16 = smov [#allocation14]  }
   0xe   :  { %58 = dma.vmem_to_smem %s56_s12, 64, %s1668_s15, [#allocation13]  }
   0xf   :  { %69 = dma.hbm_to_smem %s67_s14, 64, %s1669_s16, [#allocation9]  }
  0x10   :  { %s76_s18 = sshll.u32 %s3105_s7, 4  ;;  %s1670_s19 = smov [#allocation15]   ;;  %s77_s18 = int_to_ptr.hbm [resolvable:$true] %s76_s18 }
  0x11   :  { %s78_s20 = sshll.u32 %s1670_s19, 4  ;;  %s79_s20 = int_to_ptr.vmem [resolvable:$true] %s78_s20 }
  0x12   :  { %84 = dma.hbm_to_vmem [thread:$0]  %s77_s18, 16384, %s79_s20, [#allocation16], %s1665_s27, %s1665_s27, %s1666_s10  }
  0x13   :  { %1654 = dma.done.wait [#allocation8], 1024  }
  0x14   :  { %1655 = vsyncadd [#allocation8], 4294966272 }
  0x15   :  { %1656 = dma.done.wait [#allocation10], 64  }
  0x16   :  { %1657 = vsyncadd [#allocation10], 4294967232 }
  0x17   :  { %1658 = dma.done.wait [#allocation13], 64  }
  0x18   :  { %1659 = vsyncadd [#allocation13], 4294967232 }
  0x19   :  { %1660 = dma.done.wait [#allocation9], 64  }
  0x1a   :  { %1661 = vsyncadd [#allocation9], 4294967232 }
  0x1b   :  { %1662 = dma.done.wait [#allocation16], 16384  }
  0x1c   :  { %1663 = vsyncadd [#allocation16], 4294950912 }
  0x1d   :  { %111 = sfence }
  0x1e   :  { %v112_v1 = vlaneseq  ;;  %v1751_v2 = vld [vmem:[#allocation7 + $0x20] sm:$0xff]  ;;  %s1534_s3 = sld [smem:[#allocation11 + $0x1]]  ;;  %v1753_v3 = vld [vmem:[#allocation7 + $0x10] sm:$0xff]  ;;  %v1763_v9 = vld [vmem:[#allocation7 + $0x38] sm:$0xff]  ;;  %s1671_s5 = smov 1   ;;  %vm1076_vm3 = vcmask 1041409  }
  0x1f   :  { %v1755_v4 = vld [vmem:[#allocation7] sm:$0xff]  ;;  %v129_v5 = vrot.slane %v1751_v2, 7  ;;  %v127_v6 = vrot.slane %v1753_v3, 7  ;;  %v132_v10 = vrot.slane %v1763_v9, 7  ;;  %v1767_v11 = vld [vmem:[#allocation7 + $0x28] sm:$0xff]  ;;  %v1769_v12 = vld [vmem:[#allocation7 + $0x18] sm:$0xff] }
  0x20   :  { %v125_v7 = vrot.slane %v1755_v4, 7  ;;  %v1761_v8 = vshrl.u32 %v112_v1, 7  ;;  %v1783_v16 = vld [vmem:[#allocation7 + $0x8] sm:$0xff]  ;;  %v130_v18 = vrot.slane %v1767_v11, 7  ;;  %v128_v19 = vrot.slane %v1769_v12, 7  ;;  %v1813_v26 = vld [vmem:[#allocation7 + $0x30] sm:$0xff] }
  0x21   :  { %v126_v21 = vrot.slane %v1783_v16, 7  ;;  %v131_v27 = vrot.slane %v1813_v26, 7  ;;  %s1672_s7 = smov 127   ;;  %s1540_s21 = sld [smem:[#allocation11 + $0x101]]  ;;  %v315_v29 = vrot.slane %v1783_v16, 1  ;;  %v314_v30 = vrot.slane %v1755_v4, 1 }
  0x22   :  { %vm133_vm0 = vcmp.ge.s32.totalorder %v1761_v8, 1  ;;  %vm322_vm1 = vcmp.le.s32.totalorder %v1761_v8, 6  ;;  %v321_v33 = vrot.slane %v1763_v9, 1  ;;  %v317_v36 = vrot.slane %v1769_v12, 1  ;;  %s158_s22 = sld [smem:[#allocation11]] }
  0x23   :  { %v1773_v13 = vsel %vm133_vm0, %v129_v5, 0.0  ;;  %v1777_v14 = vsel %vm133_vm0, %v127_v6, 0.0  ;;  %v1781_v15 = vsel %vm133_vm0, %v125_v7, 0.0  ;;  %v141_v20 = vsel %vm133_vm0, %v132_v10, 0.0  ;;  %s1535_s23 = sld [smem:[#allocation11 + $0x2]] }
  0x24   :  { %150 = vrot.lane.b32.xlu2 %v1773_v13, %s1671_s5  ;;  %146 = vrot.lane.b32.xlu1 %v1777_v14, %s1671_s5  ;;  %v1789_v17 = vstv %s1534_s3  ;;  %v1803_v23 = vsel %vm133_vm0, %v130_v18, 0.0  ;;  %v1807_v24 = vsel %vm133_vm0, %v128_v19, 0.0  ;;  %v1811_v25 = vsel %vm133_vm0, %v126_v21, 0.0  ;;  %s1536_s24 = sld [smem:[#allocation11 + $0x80]] }
  0x25   :  { %142 = vrot.lane.b32.xlu0 %v1781_v15, %s1671_s5  ;;  %v1799_v22 = vmul.f32 %v1789_v17, %v141_v20  ;;  %v1824_v28 = vsel %vm133_vm0, %v131_v27, 0.0  ;;  %v1871_v31 = vsel %vm322_vm1, %v315_v29, 0.0  ;;  %v1875_v32 = vsel %vm322_vm1, %v314_v30, 0.0  ;;  %s1537_s25 = sld [smem:[#allocation11 + $0x81]] }
  0x26   :  { %v330_v35 = vsel %vm322_vm1, %v321_v33, 0.0  ;;  %v1894_v38 = vsel %vm322_vm1, %v317_v36, 0.0  ;;  %v316_v39 = vrot.slane %v1753_v3, 1  ;;  %v318_v40 = vrot.slane %v1751_v2, 1  ;;  %s1538_s26 = sld [smem:[#allocation11 + $0x82]] }
  0x27   :  { %v1878_v34 = vstv %s1540_s21  ;;  %v182_v44 = vmul.f32 %v1789_v17, %v1773_v13  ;;  %v319_v45 = vrot.slane %v1767_v11, 1  ;;  %v183_v50 = vmul.f32 %v1789_v17, %v1803_v23  ;;  %s1539_s27 = sld [smem:[#allocation11 + $0x100]] }
  0x28   :  { %v1890_v37 = vmul.f32 %v1878_v34, %v330_v35  ;;  %v1906_v41 = vsel %vm322_vm1, %v316_v39, 0.0  ;;  %v1910_v42 = vsel %vm322_vm1, %v318_v40, 0.0  ;;  %v159_v43 = vstv %s158_s22  ;;  %s1541_s10 = sld [smem:[#allocation11 + $0x102]] }
  0x29   :  { %v1925_v49 = vsel %vm322_vm1, %v319_v45, 0.0  ;;  %v320_v51 = vrot.slane %v1813_v26, 1  ;;  %v180_v57 = vmul.f32 %v1789_v17, %v1777_v14  ;;  %v1951_v58 = vstv %s1535_s23  ;;  %s475_s30 = sld [smem:[#allocation12]] }
  0x2a   :  { %v178_v59 = vmul.f32 %v1789_v17, %v1781_v15  ;;  %s1543_s12 = sld [smem:[#allocation12 + $0x2]]  ;;  %vm1079_vm4 = vcmask 1042434   ;;  %vm1085_vm5 = vcmask 1044484   ;;  %vm1082_vm6 = vcmask 1043459  }
  0x2b   :  { %v1938_v55 = vsel %vm322_vm1, %v320_v51, 0.0  ;;  %s1544_s0 = sld [smem:[#allocation12 + $0x80]]  ;;  %vm1088_vm7 = vcmask 1045509   ;;  %vm1091_vm8 = vcmask 1046534   ;;  %vm1094_vm9 = vcmask 1047559  }
  0x2c   :  { %152 = vrot.lane.b32.xlu2 %v1803_v23, %s1671_s5  ;;  %148 = vrot.lane.b32.xlu1 %v1807_v24, %s1671_s5  ;;  %s1545_s13 = sld [smem:[#allocation12 + $0x81]]  ;;  %vm1523_vm10 = vcmask 7168  }
  0x2d   :  { %144 = vrot.lane.b32.xlu0 %v1811_v25, %s1671_s5  ;;  %s1546_s14 = sld [smem:[#allocation12 + $0x82]] }
  0x2e   :  { %s1547_s15 = sld [smem:[#allocation12 + $0x100]] }
  0x2f   :  { %s1548_s16 = sld [smem:[#allocation12 + $0x101]] }
  0x30   :  { %s1549_s1 = sld [smem:[#allocation12 + $0x102]] }
  0x31   :  { %s1550_s19 = sld [smem:[#allocation14 + $0x1]] }
  0x32   :  { %s1551_s20 = sld [smem:[#allocation14 + $0x2]] }
  0x33   :  { %s1552_s3 = sld [smem:[#allocation14 + $0x80]] }
  0x34   :  { %156 = vrot.lane.b32.xlu1 %v141_v20, %s1671_s5  ;;  %194 = vrot.lane.b32.xlu2 %v1781_v15, %s1672_s7  ;;  %s1553_s21 = sld [smem:[#allocation14 + $0x81]] }
  0x35   :  { %154 = vrot.lane.b32.xlu0 %v1824_v28, %s1671_s5  ;;  %s2777_s22 = sld [smem:[#allocation14 + $0x100]] }
  0x36   :  { %s2795_s23 = sld [smem:[#allocation14 + $0x102]] }
  0x3c   :  { %198 = vrot.lane.b32.xlu1 %v1777_v14, %s1672_s7  ;;  %200 = vrot.lane.b32.xlu2 %v1807_v24, %s1672_s7  ;;  %v179_v14 = vmul.f32 %v1789_v17, %v1811_v25 }
  0x3d   :  { %196 = vrot.lane.b32.xlu0 %v1811_v25, %s1672_s7 }
  0x44   :  { %204 = vrot.lane.b32.xlu1 %v1803_v23, %s1672_s7  ;;  %206 = vrot.lane.b32.xlu2 %v1824_v28, %s1672_s7 }
  0x45   :  { %202 = vrot.lane.b32.xlu0 %v1773_v13, %s1672_s7  ;;  %v181_v13 = vmul.f32 %v1789_v17, %v1807_v24  ;;  %v184_v24 = vmul.f32 %v1789_v17, %v1824_v28 }
  0x4c   :  { %228 = vrot.lane.b32.xlu1 %v1755_v4, %s1671_s5  ;;  %230 = vrot.lane.b32.xlu2 %v1783_v16, %s1671_s5 }
  0x4d   :  { %208 = vrot.lane.b32.xlu0 %v141_v20, %s1672_s7 }
  0x54   :  { %234 = vrot.lane.b32.xlu1 %v1769_v12, %s1671_s5  ;;  %236 = vrot.lane.b32.xlu2 %v1751_v2, %s1671_s5 }
  0x55   :  { %232 = vrot.lane.b32.xlu0 %v1753_v3, %s1671_s5 }
  0x5c   :  { %280 = vrot.lane.b32.xlu1 %v1755_v4, %s1672_s7  ;;  %282 = vrot.lane.b32.xlu2 %v1783_v16, %s1672_s7 }
  0x5d   :  { %238 = vrot.lane.b32.xlu0 %v1767_v11, %s1671_s5 }
  0x64   :  { %242 = vrot.lane.b32.xlu1 %v1763_v9, %s1671_s5  ;;  %286 = vrot.lane.b32.xlu2 %v1769_v12, %s1672_s7 }
  0x65   :  { %240 = vrot.lane.b32.xlu0 %v1813_v26, %s1671_s5 }
  0x6c   :  { %333 = vrot.lane.b32.xlu1 %v1871_v31, %s1671_s5  ;;  %284 = vrot.lane.b32.xlu2 %v1753_v3, %s1672_s7 }
  0x6d   :  { %331 = vrot.lane.b32.xlu0 %v1875_v32, %s1671_s5 }
  0x74   :  { %290 = vrot.lane.b32.xlu1 %v1767_v11, %s1672_s7  ;;  %337 = vrot.lane.b32.xlu2 %v1894_v38, %s1671_s5 }
  0x75   :  { %288 = vrot.lane.b32.xlu0 %v1751_v2, %s1672_s7 }
  0x7c   :  { %335 = vrot.lane.b32.xlu1 %v1906_v41, %s1671_s5  ;;  %339 = vrot.lane.b32.xlu2 %v1910_v42, %s1671_s5 }
  0x7d   :  { %292 = vrot.lane.b32.xlu0 %v1813_v26, %s1672_s7 }
  0x7e   :  { %v151_v46 = vpop.permute.xlu2 %150 }
  0x7f   :  { %v164_v47 = vmul.f32 %v159_v43, %v151_v46 }
  0x81   :  { %v1921_v48 = vadd.f32 %v182_v44, %v164_v47  ;;  %v1976_v47 = vstv %s1536_s24 }
  0x84   :  { %341 = vrot.lane.b32.xlu1 %v1925_v49, %s1671_s5  ;;  %383 = vrot.lane.b32.xlu2 %v1875_v32, %s1672_s7 }
  0x85   :  { %294 = vrot.lane.b32.xlu0 %v1763_v9, %s1672_s7 }
  0x86   :  { %v153_v52 = vpop.permute.xlu2 %152 }
  0x87   :  { %v165_v53 = vmul.f32 %v159_v43, %v153_v52 }
  0x89   :  { %v191_v54 = vadd.f32 %v183_v50, %v165_v53 }
  0x8c   :  { %343 = vrot.lane.b32.xlu1 %v1938_v55, %s1671_s5  ;;  %345 = vrot.lane.b32.xlu2 %v330_v35, %s1671_s5 }
  0x8d   :  { %385 = vrot.lane.b32.xlu0 %v1871_v31, %s1672_s7 }
  0x8e   :  { %v195_v56 = vpop.permute.xlu2 %194 }
  0x8f   :  { %v212_v0 = vmul.f32 %v1951_v58, %v195_v56 }
  0x94   :  { %387 = vrot.lane.b32.xlu1 %v1906_v41, %s1672_s7  ;;  %391 = vrot.lane.b32.xlu2 %v1910_v42, %s1672_s7 }
  0x95   :  { %389 = vrot.lane.b32.xlu0 %v1894_v38, %s1672_s7 }
  0x96   :  { %v147_v60 = vpop.permute.xlu1 %146  ;;  %v201_v61 = vpop.permute.xlu2 %200 }
  0x97   :  { %v162_v62 = vmul.f32 %v159_v43, %v147_v60  ;;  %v143_v63 = vpop.permute.xlu0 %142  ;;  %v215_v19 = vmul.f32 %v1951_v58, %v201_v61 }
  0x98   :  { %v160_v5 = vmul.f32 %v159_v43, %v143_v63 }
  0x99   :  { %v188_v6 = vadd.f32 %v180_v57, %v162_v62 }
  0x9a   :  { %v186_v7 = vadd.f32 %v178_v59, %v160_v5 }
  0x9c   :  { %395 = vrot.lane.b32.xlu1 %v1938_v55, %s1672_s7  ;;  %397 = vrot.lane.b32.xlu2 %v330_v35, %s1672_s7  ;;  %v1961_v10 = vadd.f32 %v212_v0, %v186_v7 }
  0x9d   :  { %393 = vrot.lane.b32.xlu0 %v1925_v49, %s1672_s7 }
  0x9e   :  { %v149_v15 = vpop.permute.xlu1 %148  ;;  %v207_v18 = vpop.permute.xlu2 %206 }
  0x9f   :  { %v163_v20 = vmul.f32 %v159_v43, %v149_v15  ;;  %v145_v21 = vpop.permute.xlu0 %144  ;;  %v218_v25 = vmul.f32 %v1951_v58, %v207_v18 }
  0xa0   :  { %v161_v23 = vmul.f32 %v159_v43, %v145_v21  ;;  %v1996_v21 = vstv %s1538_s26 }
  0xa1   :  { %v189_v27 = vadd.f32 %v181_v13, %v163_v20  ;;  %v1991_v13 = vstv %s1537_s25 }
  0xa2   :  { %v187_v29 = vadd.f32 %v179_v14, %v161_v23  ;;  %v267_v18 = vmul.f32 %v1991_v13, %v1769_v12 }
  0xa3   :  { %v223_v30 = vadd.f32 %v215_v19, %v189_v27 }
  0xa6   :  { %v157_v33 = vpop.permute.xlu1 %156  ;;  %v231_v35 = vpop.permute.xlu2 %230 }
  0xa7   :  { %v167_v36 = vmul.f32 %v159_v43, %v157_v33  ;;  %v155_v39 = vpop.permute.xlu0 %154  ;;  %v247_v17 = vmul.f32 %v1976_v47, %v231_v35  ;;  %v370_v35 = vmul.f32 %v1878_v34, %v1894_v38 }
  0xa8   :  { %v166_v40 = vmul.f32 %v159_v43, %v155_v39 }
  0xa9   :  { %v193_v44 = vadd.f32 %v1799_v22, %v167_v36 }
  0xaa   :  { %v192_v45 = vadd.f32 %v184_v24, %v166_v40 }
  0xac   :  { %v1974_v46 = vadd.f32 %v218_v25, %v192_v45 }
  0xae   :  { %v199_v50 = vpop.permute.xlu1 %198  ;;  %v237_v51 = vpop.permute.xlu2 %236 }
  0xaf   :  { %v214_v52 = vmul.f32 %v1951_v58, %v199_v50  ;;  %v197_v53 = vpop.permute.xlu0 %196 }
  0xb0   :  { %v213_v28 = vmul.f32 %v1951_v58, %v197_v53  ;;  %v271_v53 = vmul.f32 %v1991_v13, %v1763_v9  ;;  %v2023_v9 = vstv %s1541_s10 }
  0xb1   :  { %v1981_v56 = vadd.f32 %v214_v52, %v188_v6 }
  0xb2   :  { %v221_v57 = vadd.f32 %v213_v28, %v187_v29  ;;  %v1999_v29 = vstv %s1539_s27  ;;  %v264_v28 = vmul.f32 %v1991_v13, %v1755_v4 }
  0xb4   :  { %v1983_v43 = vadd.f32 %v247_v17, %v221_v57 }
  0xb6   :  { %v205_v22 = vpop.permute.xlu1 %204  ;;  %v1985_v59 = vpop.permute.xlu2 %282 }
  0xb7   :  { %v217_v60 = vmul.f32 %v1951_v58, %v205_v22  ;;  %v203_v61 = vpop.permute.xlu0 %202 }
  0xb8   :  { %v216_v22 = vmul.f32 %v1951_v58, %v203_v61 }
  0xb9   :  { %v1988_v62 = vadd.f32 %v217_v60, %v191_v54 }
  0xba   :  { %v224_v4 = vadd.f32 %v216_v22, %v1921_v48  ;;  %v2038_v48 = vstv %s3100_s2  ;;  %v369_v22 = vmul.f32 %v1878_v34, %v1906_v41  ;;  %v269_v41 = vmul.f32 %v1991_v13, %v1767_v11  ;;  %s1542_s2 = sld [smem:[#allocation12 + $0x1]] }
  0xbb   :  { %v372_v11 = vmul.f32 %v1878_v34, %v1925_v49 }
  0xbe   :  { %v229_v63 = vpop.permute.xlu1 %228  ;;  %v287_v0 = vpop.permute.xlu2 %286 }
  0xbf   :  { %v209_v5 = vpop.permute.xlu0 %208  ;;  %v301_v23 = vmul.f32 %v1996_v21, %v287_v0 }
  0xc0   :  { %v219_v7 = vmul.f32 %v1951_v58, %v209_v5 }
  0xc2   :  { %v227_v6 = vadd.f32 %v219_v7, %v193_v44  ;;  %v367_v7 = vmul.f32 %v1878_v34, %v1875_v32  ;;  %v268_v32 = vmul.f32 %v1991_v13, %v1751_v2 }
  0xc6   :  { %v235_v14 = vpop.permute.xlu1 %234  ;;  %v285_v15 = vpop.permute.xlu2 %284 }
  0xc7   :  { %v249_v19 = vmul.f32 %v1976_v47, %v235_v14  ;;  %v233_v54 = vpop.permute.xlu0 %232 }
  0xc9   :  { %v257_v20 = vadd.f32 %v249_v19, %v223_v30  ;;  %v246_v30 = vmul.f32 %v1976_v47, %v229_v63  ;;  %v248_v19 = vmul.f32 %v1976_v47, %v233_v54 }
  0xcb   :  { %v275_v27 = vadd.f32 %v267_v18, %v257_v20  ;;  %v254_v17 = vadd.f32 %v246_v30, %v1961_v10  ;;  %v250_v10 = vmul.f32 %v1976_v47, %v237_v51  ;;  %v256_v54 = vadd.f32 %v248_v19, %v1981_v56 }
  0xcd   :  { %v309_v36 = vadd.f32 %v301_v23, %v275_v27  ;;  %v272_v63 = vadd.f32 %v264_v28, %v254_v17  ;;  %v258_v20 = vadd.f32 %v250_v10, %v224_v4  ;;  %v2033_v27 = vand.u32 127, %v112_v1 }
  0xce   :  { %v281_v24 = vpop.permute.xlu1 %280  ;;  %v338_v33 = vpop.permute.xlu2 %337 }
  0xcf   :  { %v352_v39 = vmul.f32 %v1999_v29, %v338_v33  ;;  %v239_v12 = vpop.permute.xlu0 %238  ;;  %v298_v60 = vmul.f32 %v1996_v21, %v281_v24  ;;  %v276_v2 = vadd.f32 %v268_v32, %v258_v20  ;;  %vm116_vm2 = vcmp.lt.s32.totalorder %v2033_v27, 90 }
  0xd0   :  { %v251_v17 = vmul.f32 %v1976_v47, %v239_v12 }
  0xd1   :  { %v360_v25 = vadd.f32 %v352_v39, %v309_v36  ;;  %v306_v14 = vadd.f32 %v298_v60, %v272_v63 }
  0xd2   :  { %v259_v12 = vadd.f32 %v251_v17, %v1988_v62  ;;  %v299_v62 = vmul.f32 %v1996_v21, %v1985_v59  ;;  %v270_v59 = vmul.f32 %v1991_v13, %v1813_v26 }
  0xd3   :  { %v2004_v40 = vadd.f32 %v370_v35, %v360_v25  ;;  %v266_v35 = vmul.f32 %v1991_v13, %v1753_v3  ;;  %v371_v25 = vmul.f32 %v1878_v34, %v1910_v42 }
  0xd4   :  { %v277_v20 = vadd.f32 %v269_v41, %v259_v12 }
  0xd5   :  { %v274_v3 = vadd.f32 %v266_v35, %v256_v54 }
  0xd6   :  { %v243_v44 = vpop.permute.xlu1 %242  ;;  %v340_v45 = vpop.permute.xlu2 %339 }
  0xd7   :  { %v253_v50 = vmul.f32 %v1976_v47, %v243_v44  ;;  %v2008_v52 = vpop.permute.xlu0 %240  ;;  %v353_v30 = vmul.f32 %v1999_v29, %v340_v45 }
  0xd8   :  { %v252_v19 = vmul.f32 %v1976_v47, %v2008_v52 }
  0xd9   :  { %v261_v38 = vadd.f32 %v253_v50, %v227_v6 }
  0xda   :  { %v260_v49 = vadd.f32 %v252_v19, %v1974_v46 }
  0xdb   :  { %v2015_v57 = vadd.f32 %v271_v53, %v261_v38  ;;  %v300_v53 = vmul.f32 %v1996_v21, %v285_v15 }
  0xdc   :  { %v278_v26 = vadd.f32 %v270_v59, %v260_v49 }
  0xdd   :  { %v308_v63 = vadd.f32 %v300_v53, %v274_v3 }
  0xde   :  { %v2019_v0 = vpop.permute.xlu1 %333  ;;  %v384_v5 = vpop.permute.xlu2 %383 }
  0xdf   :  { %v332_v6 = vpop.permute.xlu0 %331  ;;  %v401_v58 = vmul.f32 %v2023_v9, %v384_v5 }
  0xe0   :  { %v349_v18 = vmul.f32 %v1999_v29, %v332_v6 }
  0xe2   :  { %v357_v61 = vadd.f32 %v349_v18, %v306_v14 }
  0xe4   :  { %v375_v23 = vadd.f32 %v367_v7, %v357_v61  ;;  %v265_v61 = vmul.f32 %v1991_v13, %v1783_v16  ;;  %v350_v16 = vmul.f32 %v1999_v29, %v2019_v0 }
  0xe6   :  { %v409_v51 = vadd.f32 %v401_v58, %v375_v23  ;;  %v291_v24 = vpop.permute.xlu1 %290  ;;  %v346_v33 = vpop.permute.xlu2 %345  ;;  %v273_v54 = vadd.f32 %v265_v61, %v1983_v43 }
  0xe7   :  { %v289_v36 = vpop.permute.xlu0 %288  ;;  %v303_v14 = vmul.f32 %v1996_v21, %v291_v24 }
  0xe8   :  { %v419_v39 = vadd.f32 %v2038_v48, %v409_v51  ;;  %v302_v1 = vmul.f32 %v1996_v21, %v289_v36  ;;  %v307_v43 = vadd.f32 %v299_v62, %v273_v54 }
  0xe9   :  { %v311_v51 = vadd.f32 %v303_v14, %v277_v20 }
  0xea   :  { %v427_v44 = vmax.f32 %v419_v39, 0.0  ;;  %v310_v50 = vadd.f32 %v302_v1, %v276_v2  ;;  %v356_v2 = vmul.f32 %v1999_v29, %v346_v33  ;;  %v373_v33 = vmul.f32 %v1878_v34, %v1938_v55 }
  0xec   :  { %v361_v38 = vadd.f32 %v353_v30, %v310_v50  ;;  %v2052_v56 = vsel %vm116_vm2, %v427_v44, 0.0  ;;  %v368_v44 = vmul.f32 %v1878_v34, %v1871_v31  ;;  %v358_v50 = vadd.f32 %v350_v16, %v307_v43 }
  0xed   :  { %v443_v28 = vrot.slane %v2052_v56, 7 }
  0xee   :  { %v336_v42 = vpop.permute.xlu1 %335  ;;  %v392_v60 = vpop.permute.xlu2 %391  ;;  %v379_v45 = vadd.f32 %v371_v25, %v361_v38 }
  0xef   :  { %v351_v5 = vmul.f32 %v1999_v29, %v336_v42  ;;  %v405_v15 = vmul.f32 %v2023_v9, %v392_v60  ;;  %v293_v7 = vpop.permute.xlu0 %292  ;;  %v2062_v6 = vsel %vm133_vm0, %v443_v28, 0.0  ;;  %v376_v28 = vadd.f32 %v368_v44, %v358_v50 }
  0xf0   :  { %459 = vrot.lane.b32.xlu0 %v2062_v6, %s1671_s5  ;;  %v304_v1 = vmul.f32 %v1996_v21, %v293_v7  ;;  %v631_v50 = vrot.slane %v2052_v56, 1 }
  0xf1   :  { %v359_v10 = vadd.f32 %v351_v5, %v308_v63  ;;  %v413_v4 = vadd.f32 %v405_v15, %v379_v45 }
  0xf3   :  { %v423_v18 = vadd.f32 %v2038_v48, %v413_v4  ;;  %v377_v58 = vadd.f32 %v369_v22, %v359_v10 }
  0xf5   :  { %v431_v23 = vmax.f32 %v423_v18, 0.0 }
  0xf6   :  { %v342_v32 = vpop.permute.xlu1 %341  ;;  %v398_v39 = vpop.permute.xlu2 %397 }
  0xf7   :  { %v354_v24 = vmul.f32 %v1999_v29, %v342_v32  ;;  %v295_v35 = vpop.permute.xlu0 %294  ;;  %v2085_v47 = vsel %vm116_vm2, %v431_v23, 0.0  ;;  %v408_v53 = vmul.f32 %v2023_v9, %v398_v39 }
  0xf8   :  { %v305_v52 = vmul.f32 %v1996_v21, %v295_v35  ;;  %511 = vrot.lane.b32.xlu0 %v2062_v6, %s1672_s7  ;;  %v447_v25 = vrot.slane %v2085_v47, 7 }
  0xf9   :  { %v362_v36 = vadd.f32 %v354_v24, %v311_v51 }
  0xfa   :  { %v313_v0 = vadd.f32 %v305_v52, %v2015_v57  ;;  %v312_v57 = vadd.f32 %v304_v1, %v278_v26  ;;  %v2106_v17 = vsel %vm133_vm0, %v447_v25, 0.0 }
  0xfb   :  { %v380_v30 = vadd.f32 %v372_v11, %v362_v36 }
  0xfc   :  { %v364_v46 = vadd.f32 %v356_v2, %v313_v0 }
  0xfe   :  { %v382_v13 = vadd.f32 %v1890_v37, %v364_v46  ;;  %v344_v3 = vpop.permute.xlu1 %343  ;;  %v2217_v46 = vsel %vm322_vm1, %v631_v50, 0.0 }
  0xff   :  { %v355_v21 = vmul.f32 %v1999_v29, %v344_v3  ;;  %v386_v38 = vpop.permute.xlu0 %385 }
 0x100   :  { %v416_v31 = vadd.f32 %v408_v53, %v382_v13  ;;  %v402_v22 = vmul.f32 %v2023_v9, %v386_v38  ;;  %467 = vrot.lane.b32.xlu0 %v2106_v17, %s1671_s5 }
 0x101   :  { %v363_v37 = vadd.f32 %v355_v21, %v312_v57  ;;  %v2254_v57 = vstv %s475_s30 }
 0x102   :  { %v426_v42 = vadd.f32 %v2038_v48, %v416_v31  ;;  %v410_v60 = vadd.f32 %v402_v22, %v376_v28 }
 0x103   :  { %v381_v34 = vadd.f32 %v373_v33, %v363_v37  ;;  %v2252_v33 = vstv %s1542_s2 }
 0x104   :  { %v420_v55 = vadd.f32 %v2038_v48, %v410_v60  ;;  %v434_v0 = vmax.f32 %v426_v42, 0.0  ;;  %v495_v38 = vmul.f32 %v2252_v33, %v2062_v6  ;;  %v635_v6 = vrot.slane %v2085_v47, 1 }
 0x105   :  { %v2275_v60 = vstv %s1543_s12 }
 0x106   :  { %v428_v29 = vmax.f32 %v420_v55, 0.0  ;;  %v388_v45 = vpop.permute.xlu1 %387  ;;  %v2191_v25 = vsel %vm116_vm2, %v434_v0, 0.0 }
 0x107   :  { %v403_v63 = vmul.f32 %v2023_v9, %v388_v45  ;;  %v390_v5 = vpop.permute.xlu0 %389 }
 0x108   :  { %v2116_v15 = vsel %vm116_vm2, %v428_v29, 0.0  ;;  %v404_v7 = vmul.f32 %v2023_v9, %v390_v5  ;;  %545 = vrot.lane.b32.xlu0 %v2052_v56, %s1671_s5  ;;  %v2280_v29 = vsel %vm322_vm1, %v635_v6, 0.0 }
 0x109   :  { %v411_v12 = vadd.f32 %v403_v63, %v377_v58  ;;  %v444_v41 = vrot.slane %v2116_v15, 7  ;;  %v632_v53 = vrot.slane %v2116_v15, 1 }
 0x10a   :  { %v412_v10 = vadd.f32 %v404_v7, %v2004_v40 }
 0x10b   :  { %v421_v4 = vadd.f32 %v2038_v48, %v411_v12  ;;  %v2126_v14 = vsel %vm133_vm0, %v444_v41, 0.0  ;;  %v2236_v26 = vsel %vm322_vm1, %v632_v53, 0.0 }
 0x10c   :  { %v422_v18 = vadd.f32 %v2038_v48, %v412_v10  ;;  %461 = vrot.lane.b32.xlu1 %v2126_v14, %s1671_s5 }
 0x10d   :  { %v429_v61 = vmax.f32 %v421_v4, 0.0 }
 0x10e   :  { %v430_v19 = vmax.f32 %v422_v18, 0.0  ;;  %v396_v32 = vpop.permute.xlu1 %395  ;;  %v499_v18 = vmul.f32 %v2252_v33, %v2106_v17 }
 0x10f   :  { %v2133_v58 = vsel %vm116_vm2, %v429_v61, 0.0  ;;  %v394_v20 = vpop.permute.xlu0 %393  ;;  %v407_v54 = vmul.f32 %v2023_v9, %v396_v32  ;;  %v638_v32 = vrot.slane %v2191_v25, 1 }
 0x110   :  { %v2137_v40 = vsel %vm116_vm2, %v430_v19, 0.0  ;;  %v406_v23 = vmul.f32 %v2023_v9, %v394_v20  ;;  %v445_v62 = vrot.slane %v2133_v58, 7  ;;  %v633_v3 = vrot.slane %v2133_v58, 1 }
 0x111   :  { %v446_v11 = vrot.slane %v2137_v40, 7  ;;  %v415_v49 = vadd.f32 %v407_v54, %v381_v34  ;;  %v634_v13 = vrot.slane %v2137_v40, 1 }
 0x112   :  { %v414_v51 = vadd.f32 %v406_v23, %v380_v30  ;;  %v2144_v24 = vsel %vm133_vm0, %v445_v62, 0.0  ;;  %v450_v30 = vrot.slane %v2191_v25, 7  ;;  %v2265_v22 = vsel %vm322_vm1, %v633_v3, 0.0 }
 0x113   :  { %v2148_v35 = vsel %vm133_vm0, %v446_v11, 0.0  ;;  %515 = vrot.lane.b32.xlu0 %v2144_v24, %s1672_s7  ;;  %v425_v9 = vadd.f32 %v2038_v48, %v415_v49  ;;  %v2261_v28 = vsel %vm322_vm1, %v634_v13, 0.0  ;;  %v497_v62 = vmul.f32 %v2252_v33, %v2144_v24 }
 0x114   :  { %v424_v16 = vadd.f32 %v2038_v48, %v414_v51  ;;  %513 = vrot.lane.b32.xlu1 %v2126_v14, %s1672_s7  ;;  %465 = vrot.lane.b32.xlu2 %v2148_v35, %s1671_s5  ;;  %v2202_v44 = vsel %vm133_vm0, %v450_v30, 0.0  ;;  %v498_v7 = vmul.f32 %v2252_v33, %v2148_v35  ;;  %v2313_v11 = vstv %s1544_s0 }
 0x115   :  { %v433_v43 = vmax.f32 %v425_v9, 0.0 }
 0x116   :  { %v432_v52 = vmax.f32 %v424_v16, 0.0  ;;  %v2318_v16 = vsel %vm322_vm1, %v638_v32, 0.0 }
 0x117   :  { %v2176_v2 = vsel %vm116_vm2, %v433_v43, 0.0 }
 0x118   :  { %v2160_v59 = vsel %vm116_vm2, %v432_v52, 0.0  ;;  %v449_v48 = vrot.slane %v2176_v2, 7  ;;  %v637_v41 = vrot.slane %v2176_v2, 1 }
 0x119   :  { %v448_v36 = vrot.slane %v2160_v59, 7  ;;  %v636_v42 = vrot.slane %v2160_v59, 1 }
 0x11a   :  { %v2187_v1 = vsel %vm133_vm0, %v449_v48, 0.0  ;;  %v2301_v19 = vsel %vm322_vm1, %v637_v41, 0.0 }
 0x11b   :  { %v2165_v39 = vsel %vm133_vm0, %v448_v36, 0.0  ;;  %v2284_v45 = vsel %vm322_vm1, %v636_v42, 0.0  ;;  %v496_v36 = vmul.f32 %v2252_v33, %v2126_v14  ;;  %v501_v14 = vmul.f32 %v2252_v33, %v2187_v1 }
 0x11c   :  { %463 = vrot.lane.b32.xlu2 %v2144_v24, %s1671_s5  ;;  %469 = vrot.lane.b32.xlu1 %v2165_v39, %s1671_s5  ;;  %v500_v6 = vmul.f32 %v2252_v33, %v2165_v39  ;;  %v502_v42 = vmul.f32 %v2252_v33, %v2202_v44 }
 0x11d   :  { %521 = vrot.lane.b32.xlu0 %v2165_v39, %s1672_s7 }
 0x124   :  { %517 = vrot.lane.b32.xlu2 %v2148_v35, %s1672_s7  ;;  %547 = vrot.lane.b32.xlu1 %v2116_v15, %s1671_s5 }
 0x125   :  { %549 = vrot.lane.b32.xlu0 %v2133_v58, %s1671_s5 }
 0x12c   :  { %471 = vrot.lane.b32.xlu2 %v2187_v1, %s1671_s5  ;;  %519 = vrot.lane.b32.xlu1 %v2106_v17, %s1672_s7 }
 0x12d   :  { %555 = vrot.lane.b32.xlu0 %v2160_v59, %s1671_s5 }
 0x134   :  { %473 = vrot.lane.b32.xlu2 %v2202_v44, %s1671_s5  ;;  %551 = vrot.lane.b32.xlu1 %v2137_v40, %s1671_s5 }
 0x135   :  { %557 = vrot.lane.b32.xlu0 %v2176_v2, %s1671_s5 }
 0x13c   :  { %523 = vrot.lane.b32.xlu2 %v2187_v1, %s1672_s7  ;;  %553 = vrot.lane.b32.xlu1 %v2085_v47, %s1671_s5 }
 0x13d   :  { %647 = vrot.lane.b32.xlu0 %v2217_v46, %s1671_s5 }
 0x144   :  { %525 = vrot.lane.b32.xlu2 %v2202_v44, %s1672_s7  ;;  %597 = vrot.lane.b32.xlu1 %v2052_v56, %s1672_s7 }
 0x145   :  { %605 = vrot.lane.b32.xlu0 %v2085_v47, %s1672_s7 }
 0x14c   :  { %599 = vrot.lane.b32.xlu2 %v2116_v15, %s1672_s7  ;;  %559 = vrot.lane.b32.xlu1 %v2191_v25, %s1671_s5 }
 0x14d   :  { %609 = vrot.lane.b32.xlu0 %v2176_v2, %s1672_s7 }
 0x154   :  { %603 = vrot.lane.b32.xlu2 %v2137_v40, %s1672_s7  ;;  %649 = vrot.lane.b32.xlu1 %v2236_v26, %s1671_s5 }
 0x155   :  { %611 = vrot.lane.b32.xlu0 %v2191_v25, %s1672_s7 }
 0x15c   :  { %601 = vrot.lane.b32.xlu2 %v2133_v58, %s1672_s7  ;;  %607 = vrot.lane.b32.xlu1 %v2160_v59, %s1672_s7 }
 0x15d   :  { %701 = vrot.lane.b32.xlu0 %v2236_v26, %s1672_s7 }
 0x162   :  { %v460_v21 = vpop.permute.xlu0 %459 }
 0x163   :  { %v477_v31 = vmul.f32 %v2254_v57, %v460_v21 }
 0x164   :  { %653 = vrot.lane.b32.xlu2 %v2261_v28, %s1671_s5  ;;  %651 = vrot.lane.b32.xlu1 %v2265_v22, %s1671_s5 }
 0x165   :  { %v503_v37 = vadd.f32 %v495_v38, %v477_v31  ;;  %705 = vrot.lane.b32.xlu0 %v2261_v28, %s1672_s7 }
 0x16a   :  { %v512_v34 = vpop.permute.xlu0 %511 }
 0x16b   :  { %v529_v55 = vmul.f32 %v2275_v60, %v512_v34 }
 0x16c   :  { %655 = vrot.lane.b32.xlu2 %v2280_v29, %s1671_s5  ;;  %657 = vrot.lane.b32.xlu1 %v2284_v45, %s1671_s5 }
 0x16d   :  { %v537_v63 = vadd.f32 %v529_v55, %v503_v37  ;;  %709 = vrot.lane.b32.xlu0 %v2284_v45, %s1672_s7 }
 0x16e   :  { %v466_v5 = vpop.permute.xlu2 %465 }
 0x16f   :  { %v480_v12 = vmul.f32 %v2254_v57, %v466_v5 }
 0x171   :  { %v506_v10 = vadd.f32 %v498_v7, %v480_v12 }
 0x172   :  { %v468_v4 = vpop.permute.xlu0 %467 }
 0x173   :  { %v481_v61 = vmul.f32 %v2254_v57, %v468_v4 }
 0x174   :  { %659 = vrot.lane.b32.xlu1 %v2301_v19, %s1671_s5  ;;  %699 = vrot.lane.b32.xlu2 %v2217_v46, %s1672_s7 }
 0x175   :  { %v2307_v20 = vadd.f32 %v499_v18, %v481_v61 }
 0x176   :  { %v464_v23 = vpop.permute.xlu2 %463 }
 0x177   :  { %v479_v17 = vmul.f32 %v2254_v57, %v464_v23 }
 0x179   :  { %v505_v51 = vadd.f32 %v497_v62, %v479_v17 }
 0x17a   :  { %v546_v35 = vpop.permute.xlu0 %545 }
 0x17b   :  { %v563_v54 = vmul.f32 %v2313_v11, %v546_v35 }
 0x17c   :  { %703 = vrot.lane.b32.xlu1 %v2265_v22, %s1672_s7  ;;  %661 = vrot.lane.b32.xlu2 %v2318_v16, %s1671_s5 }
 0x17d   :  { %v2324_v24 = vadd.f32 %v563_v54, %v537_v63 }
 0x17e   :  { %v462_v52 = vpop.permute.xlu1 %461  ;;  %v518_v49 = vpop.permute.xlu2 %517 }
 0x17f   :  { %v478_v9 = vmul.f32 %v2254_v57, %v462_v52  ;;  %v532_v43 = vmul.f32 %v2275_v60, %v518_v49  ;;  %v2361_v52 = vstv %s1545_s13 }
 0x181   :  { %v504_v48 = vadd.f32 %v496_v36, %v478_v9  ;;  %v2330_v0 = vadd.f32 %v532_v43, %v506_v10  ;;  %v587_v36 = vmul.f32 %v2361_v52, %v2176_v2 }
 0x184   :  { %711 = vrot.lane.b32.xlu1 %v2301_v19, %s1672_s7  ;;  %707 = vrot.lane.b32.xlu2 %v2280_v29, %s1672_s7 }
 0x185   :  { %v516_v30 = vpop.permute.xlu0 %515 }
 0x186   :  { %v514_v50 = vpop.permute.xlu1 %513  ;;  %v472_v53 = vpop.permute.xlu2 %471  ;;  %v531_v13 = vmul.f32 %v2275_v60, %v516_v30 }
 0x187   :  { %v483_v3 = vmul.f32 %v2254_v57, %v472_v53 }
 0x188   :  { %v539_v21 = vadd.f32 %v531_v13, %v505_v51 }
 0x189   :  { %v509_v38 = vadd.f32 %v501_v14, %v483_v3 }
 0x18c   :  { %713 = vrot.lane.b32.xlu2 %v2318_v16, %s1672_s7 }
 0x18e   :  { %v474_v31 = vpop.permute.xlu2 %473  ;;  %v470_v37 = vpop.permute.xlu1 %469 }
 0x18f   :  { %v484_v34 = vmul.f32 %v2254_v57, %v474_v31  ;;  %v482_v55 = vmul.f32 %v2254_v57, %v470_v37  ;;  %v522_v1 = vpop.permute.xlu0 %521 }
 0x190   :  { %v534_v7 = vmul.f32 %v2275_v60, %v522_v1 }
 0x191   :  { %v510_v63 = vadd.f32 %v502_v42, %v484_v34  ;;  %v508_v5 = vadd.f32 %v500_v6, %v482_v55  ;;  %v2375_v42 = vstv %s1546_s14  ;;  %v581_v34 = vmul.f32 %v2361_v52, %v2052_v56 }
 0x193   :  { %v2349_v12 = vadd.f32 %v534_v7, %v508_v5  ;;  %v2384_v7 = vstv %s1547_s15 }
 0x196   :  { %v524_v41 = vpop.permute.xlu2 %523  ;;  %v548_v10 = vpop.permute.xlu1 %547 }
 0x197   :  { %v535_v4 = vmul.f32 %v2275_v60, %v524_v41  ;;  %v550_v18 = vpop.permute.xlu0 %549  ;;  %v564_v2 = vmul.f32 %v2313_v11, %v548_v10 }
 0x198   :  { %v565_v39 = vmul.f32 %v2313_v11, %v550_v18 }
 0x199   :  { %v543_v61 = vadd.f32 %v535_v4, %v509_v38 }
 0x19a   :  { %v2353_v44 = vadd.f32 %v565_v39, %v539_v21  ;;  %v530_v21 = vmul.f32 %v2275_v60, %v514_v50  ;;  %v589_v50 = vadd.f32 %v581_v34, %v2324_v24  ;;  %v2391_v24 = vstv %s1548_s16 }
 0x19c   :  { %v538_v6 = vadd.f32 %v530_v21, %v504_v48 }
 0x19e   :  { %v526_v33 = vpop.permute.xlu2 %525  ;;  %v520_v23 = vpop.permute.xlu1 %519  ;;  %v572_v1 = vadd.f32 %v564_v2, %v538_v6 }
 0x19f   :  { %v536_v57 = vmul.f32 %v2275_v60, %v526_v33  ;;  %v2356_v62 = vpop.permute.xlu0 %555 }
 0x1a1   :  { %v2358_v17 = vadd.f32 %v536_v57, %v510_v63  ;;  %v582_v63 = vmul.f32 %v2361_v52, %v2116_v15  ;;  %v533_v15 = vmul.f32 %v2275_v60, %v520_v23 }
 0x1a3   :  { %v590_v56 = vadd.f32 %v582_v63, %v572_v1  ;;  %v585_v63 = vmul.f32 %v2361_v52, %v2085_v47 }
 0x1a6   :  { %v600_v32 = vpop.permute.xlu2 %599  ;;  %v552_v51 = vpop.permute.xlu1 %551 }
 0x1a7   :  { %v558_v35 = vpop.permute.xlu0 %557  ;;  %v616_v5 = vmul.f32 %v2375_v42, %v600_v32  ;;  %v566_v10 = vmul.f32 %v2313_v11, %v552_v51  ;;  %v683_v51 = vmul.f32 %v2391_v24, %v2217_v46 }
 0x1a8   :  { %v569_v54 = vmul.f32 %v2313_v11, %v558_v35 }
 0x1a9   :  { %v624_v33 = vadd.f32 %v616_v5, %v590_v56  ;;  %v574_v57 = vadd.f32 %v566_v10, %v2330_v0  ;;  %v541_v0 = vadd.f32 %v533_v15, %v2307_v20  ;;  %v568_v10 = vmul.f32 %v2313_v11, %v2356_v62 }
 0x1aa   :  { %v577_v49 = vadd.f32 %v569_v54, %v543_v61  ;;  %v2395_v54 = vstv %s1549_s1  ;;  %v686_v56 = vmul.f32 %v2391_v24, %v2261_v28 }
 0x1ab   :  { %v576_v28 = vadd.f32 %v568_v10, %v2349_v12 }
 0x1ac   :  { %v2365_v9 = vadd.f32 %v587_v36, %v577_v49  ;;  %v584_v49 = vmul.f32 %v2361_v52, %v2137_v40  ;;  %v684_v36 = vmul.f32 %v2391_v24, %v2236_v26  ;;  %v2411_v40 = vstv %s3102_s4  ;;  %s791_s4 = sld [smem:[#allocation14]] }
 0x1ae   :  { %v604_v43 = vpop.permute.xlu2 %603  ;;  %v554_v30 = vpop.permute.xlu1 %553  ;;  %v592_v21 = vadd.f32 %v584_v49, %v574_v57 }
 0x1af   :  { %v648_v53 = vpop.permute.xlu0 %647 }
 0x1b0   :  { %v665_v61 = vmul.f32 %v2384_v7, %v648_v53  ;;  %v618_v53 = vmul.f32 %v2375_v42, %v604_v43 }
 0x1b6   :  { %v2367_v13 = vpop.permute.xlu2 %601  ;;  %v598_v14 = vpop.permute.xlu1 %597 }
 0x1b7   :  { %v606_v3 = vpop.permute.xlu0 %605  ;;  %v615_v55 = vmul.f32 %v2375_v42, %v598_v14  ;;  %v567_v14 = vmul.f32 %v2313_v11, %v554_v30 }
 0x1b8   :  { %v619_v5 = vmul.f32 %v2375_v42, %v606_v3 }
 0x1b9   :  { %v623_v4 = vadd.f32 %v615_v55, %v589_v50  ;;  %v626_v55 = vadd.f32 %v618_v53, %v592_v21  ;;  %v575_v1 = vadd.f32 %v567_v14, %v541_v0 }
 0x1bb   :  { %v673_v32 = vadd.f32 %v665_v61, %v623_v4 }
 0x1bd   :  { %v691_v2 = vadd.f32 %v683_v51, %v673_v32 }
 0x1be   :  { %v654_v38 = vpop.permute.xlu2 %653  ;;  %v2370_v31 = vpop.permute.xlu1 %559 }
 0x1bf   :  { %v2372_v37 = vpop.permute.xlu0 %609  ;;  %v668_v46 = vmul.f32 %v2384_v7, %v654_v38 }
 0x1c1   :  { %v676_v38 = vadd.f32 %v668_v46, %v626_v55 }
 0x1c6   :  { %v656_v41 = vpop.permute.xlu2 %655  ;;  %v650_v48 = vpop.permute.xlu1 %649 }
 0x1c7   :  { %v2387_v18 = vpop.permute.xlu0 %611  ;;  %v666_v39 = vmul.f32 %v2384_v7, %v650_v48  ;;  %v669_v61 = vmul.f32 %v2384_v7, %v656_v41 }
 0x1c9   :  { %v674_v35 = vadd.f32 %v666_v39, %v624_v33  ;;  %v593_v39 = vadd.f32 %v585_v63, %v575_v1  ;;  %v688_v1 = vmul.f32 %v2391_v24, %v2284_v45  ;;  %v583_v45 = vmul.f32 %v2361_v52, %v2133_v58 }
 0x1cb   :  { %v692_v26 = vadd.f32 %v684_v36, %v674_v35  ;;  %v627_v32 = vadd.f32 %v619_v5, %v593_v39  ;;  %v694_v35 = vadd.f32 %v686_v56, %v676_v38  ;;  %v586_v36 = vmul.f32 %v2361_v52, %v2160_v59 }
 0x1cd   :  { %v677_v41 = vadd.f32 %v669_v61, %v627_v32  ;;  %v594_v12 = vadd.f32 %v586_v36, %v576_v28  ;;  %v621_v36 = vmul.f32 %v2375_v42, %v2372_v37  ;;  %v588_v37 = vmul.f32 %v2361_v52, %v2191_v25 }
 0x1ce   :  { %v608_v60 = vpop.permute.xlu1 %607  ;;  %v700_v23 = vpop.permute.xlu2 %699 }
 0x1cf   :  { %v717_v6 = vmul.f32 %v2395_v54, %v700_v23  ;;  %v702_v34 = vpop.permute.xlu0 %701  ;;  %v620_v53 = vmul.f32 %v2375_v42, %v608_v60  ;;  %v687_v23 = vmul.f32 %v2391_v24, %v2280_v29 }
 0x1d0   :  { %v718_v43 = vmul.f32 %v2395_v54, %v702_v34 }
 0x1d1   :  { %v725_v30 = vadd.f32 %v717_v6, %v691_v2  ;;  %v695_v46 = vadd.f32 %v687_v23, %v677_v41  ;;  %v685_v41 = vmul.f32 %v2391_v24, %v2265_v22 }
 0x1d2   :  { %v726_v50 = vadd.f32 %v718_v43, %v692_v26  ;;  %v628_v26 = vadd.f32 %v620_v53, %v594_v12 }
 0x1d3   :  { %v735_v20 = vadd.f32 %v2411_v40, %v725_v30 }
 0x1d4   :  { %v736_v48 = vadd.f32 %v2411_v40, %v726_v50 }
 0x1d5   :  { %v743_v4 = vmax.f32 %v735_v20, 0.0 }
 0x1d6   :  { %v744_v33 = vmax.f32 %v736_v48, 0.0  ;;  %v652_v15 = vpop.permute.xlu1 %651  ;;  %v2424_v57 = vpop.permute.xlu2 %661 }
 0x1d7   :  { %v706_v47 = vpop.permute.xlu0 %705  ;;  %v2428_v3 = vsel %vm116_vm2, %v743_v4, 0.0  ;;  %v617_v4 = vmul.f32 %v2375_v42, %v2367_v13 }
 0x1d8   :  { %v720_v62 = vmul.f32 %v2395_v54, %v706_v47  ;;  %v2433_v51 = vsel %vm116_vm2, %v744_v33, 0.0  ;;  %861 = vrot.lane.b32.xlu0 %v2428_v3, %s1671_s5  ;;  %v759_v14 = vrot.slane %v2428_v3, 7  ;;  %v591_v33 = vadd.f32 %v583_v45, %v2353_v44 }
 0x1d9   :  { %863 = vrot.lane.b32.xlu1 %v2433_v51, %s1671_s5  ;;  %v760_v21 = vrot.slane %v2433_v51, 7  ;;  %v667_v47 = vmul.f32 %v2384_v7, %v652_v15 }
 0x1da   :  { %v728_v49 = vadd.f32 %v720_v62, %v694_v35  ;;  %v2452_v60 = vsel %vm133_vm0, %v759_v14, 0.0  ;;  %v625_v58 = vadd.f32 %v617_v4, %v591_v33 }
 0x1db   :  { %v2460_v55 = vsel %vm133_vm0, %v760_v21, 0.0 }
 0x1dc   :  { %v738_v0 = vadd.f32 %v2411_v40, %v728_v49  ;;  %v675_v13 = vadd.f32 %v667_v47, %v625_v58  ;;  %v570_v49 = vmul.f32 %v2313_v11, %v2370_v31  ;;  %v629_v11 = vadd.f32 %v621_v36, %v2365_v9 }
 0x1de   :  { %v746_v2 = vmax.f32 %v738_v0, 0.0  ;;  %v658_v6 = vpop.permute.xlu1 %657  ;;  %v708_v34 = vpop.permute.xlu2 %707  ;;  %v693_v0 = vadd.f32 %v685_v41, %v675_v13  ;;  %v578_v22 = vadd.f32 %v570_v49, %v2358_v17  ;;  %v672_v17 = vmul.f32 %v2384_v7, %v2424_v57 }
 0x1df   :  { %v670_v43 = vmul.f32 %v2384_v7, %v658_v6  ;;  %v721_v59 = vmul.f32 %v2395_v54, %v708_v34  ;;  %v710_v30 = vpop.permute.xlu0 %709  ;;  %v2639_v41 = vstv %s1550_s19 }
 0x1e0   :  { %v2456_v29 = vsel %vm116_vm2, %v746_v2, 0.0  ;;  %775 = vrot.lane.b32.xlu0 %v2452_v60, %s1671_s5  ;;  %v722_v48 = vmul.f32 %v2395_v54, %v710_v30  ;;  %v622_v2 = vmul.f32 %v2375_v42, %v2387_v18 }
 0x1e1   :  { %v678_v50 = vadd.f32 %v670_v43, %v628_v26  ;;  %v729_v20 = vadd.f32 %v721_v59, %v695_v46  ;;  %777 = vrot.lane.b32.xlu1 %v2460_v55, %s1671_s5  ;;  %v762_v63 = vrot.slane %v2456_v29, 7  ;;  %v689_v46 = vmul.f32 %v2391_v24, %v2301_v19 }
 0x1e2   :  { %v596_v26 = vadd.f32 %v588_v37, %v578_v22  ;;  %v950_v36 = vrot.slane %v2456_v29, 1 }
 0x1e3   :  { %v739_v5 = vadd.f32 %v2411_v40, %v729_v20  ;;  %v696_v38 = vadd.f32 %v688_v1, %v678_v50  ;;  %v2473_v10 = vsel %vm133_vm0, %v762_v63, 0.0 }
 0x1e4   :  { %781 = vrot.lane.b32.xlu2 %v2473_v10, %s1671_s5  ;;  %v630_v59 = vadd.f32 %v622_v2, %v596_v26  ;;  %v2653_v22 = vsel %vm322_vm1, %v950_v36, 0.0  ;;  %v812_v26 = vmul.f32 %v2639_v41, %v2460_v55 }
 0x1e5   :  { %v747_v56 = vmax.f32 %v739_v5, 0.0  ;;  %v730_v39 = vadd.f32 %v722_v48, %v696_v38 }
 0x1e6   :  { %v660_v61 = vpop.permute.xlu1 %659  ;;  %v714_v42 = vpop.permute.xlu2 %713  ;;  %v680_v1 = vadd.f32 %v672_v17, %v630_v59 }
 0x1e7   :  { %v740_v32 = vadd.f32 %v2411_v40, %v730_v39  ;;  %v2486_v35 = vsel %vm116_vm2, %v747_v56, 0.0  ;;  %v671_v23 = vmul.f32 %v2384_v7, %v660_v61  ;;  %v690_v7 = vmul.f32 %v2391_v24, %v2318_v16 }
 0x1e8   :  { %827 = vrot.lane.b32.xlu0 %v2452_v60, %s1672_s7  ;;  %v763_v15 = vrot.slane %v2486_v35, 7  ;;  %v724_v57 = vmul.f32 %v2395_v54, %v714_v42  ;;  %v948_v39 = vrot.slane %v2433_v51, 1  ;;  %v947_v61 = vrot.slane %v2428_v3, 1 }
 0x1e9   :  { %v748_v62 = vmax.f32 %v740_v32, 0.0  ;;  %829 = vrot.lane.b32.xlu1 %v2460_v55, %s1672_s7  ;;  %v679_v6 = vadd.f32 %v671_v23, %v629_v11  ;;  %v698_v63 = vadd.f32 %v690_v7, %v680_v1  ;;  %v2688_v1 = vstv %s1552_s3 }
 0x1ea   :  { %v2512_v12 = vsel %vm133_vm0, %v763_v15, 0.0  ;;  %v2596_v33 = vsel %vm322_vm1, %v948_v39, 0.0  ;;  %v2602_v47 = vsel %vm322_vm1, %v947_v61, 0.0  ;;  %v2636_v15 = vstv %s791_s4 }
 0x1eb   :  { %v2494_v44 = vsel %vm116_vm2, %v748_v62, 0.0  ;;  %v697_v25 = vadd.f32 %v689_v46, %v679_v6  ;;  %v732_v5 = vadd.f32 %v724_v57, %v698_v63  ;;  %v811_v6 = vmul.f32 %v2639_v41, %v2452_v60 }
 0x1ec   :  { %v764_v28 = vrot.slane %v2494_v44, 7  ;;  %v952_v62 = vrot.slane %v2494_v44, 1 }
 0x1ed   :  { %v742_v48 = vadd.f32 %v2411_v40, %v732_v5 }
 0x1ee   :  { %v704_v53 = vpop.permute.xlu1 %703  ;;  %v2506_v14 = vsel %vm133_vm0, %v764_v28, 0.0  ;;  %v2628_v13 = vsel %vm322_vm1, %v952_v62, 0.0 }
 0x1ef   :  { %v719_v21 = vmul.f32 %v2395_v54, %v704_v53  ;;  %v814_v53 = vmul.f32 %v2639_v41, %v2473_v10 }
 0x1f0   :  { %783 = vrot.lane.b32.xlu0 %v2512_v12, %s1671_s5 }
 0x1f1   :  { %v727_v31 = vadd.f32 %v719_v21, %v693_v0  ;;  %785 = vrot.lane.b32.xlu1 %v2506_v14, %s1671_s5 }
 0x1f3   :  { %v737_v34 = vadd.f32 %v2411_v40, %v727_v31 }
 0x1f5   :  { %v745_v9 = vmax.f32 %v737_v34, 0.0 }
 0x1f6   :  { %v712_v43 = vpop.permute.xlu1 %711 }
 0x1f7   :  { %v2531_v30 = vsel %vm116_vm2, %v745_v9, 0.0  ;;  %v723_v52 = vmul.f32 %v2395_v54, %v712_v43  ;;  %v750_v54 = vmax.f32 %v742_v48, 0.0 }
 0x1f8   :  { %v761_v18 = vrot.slane %v2531_v30, 7  ;;  %v949_v32 = vrot.slane %v2531_v30, 1 }
 0x1f9   :  { %v731_v50 = vadd.f32 %v723_v52, %v697_v25  ;;  %835 = vrot.lane.b32.xlu1 %v2512_v12, %s1672_s7 }
 0x1fa   :  { %v2539_v19 = vsel %vm133_vm0, %v761_v18, 0.0  ;;  %v2617_v58 = vsel %vm322_vm1, %v949_v32, 0.0  ;;  %v2686_v18 = vstv %s1551_s20 }
 0x1fb   :  { %v741_v20 = vadd.f32 %v2411_v40, %v731_v50  ;;  %779 = vrot.lane.b32.xlu2 %v2539_v19, %s1671_s5  ;;  %831 = vrot.lane.b32.xlu0 %v2539_v19, %s1672_s7  ;;  %v2569_v40 = vsel %vm116_vm2, %v750_v54, 0.0  ;;  %v813_v60 = vmul.f32 %v2639_v41, %v2539_v19 }
 0x1fc   :  { %v766_v4 = vrot.slane %v2569_v40, 7  ;;  %v954_v52 = vrot.slane %v2569_v40, 1 }
 0x1fd   :  { %v749_v38 = vmax.f32 %v741_v20, 0.0  ;;  %v2698_v20 = vstv %s1553_s21 }
 0x1fe   :  { %v2580_v56 = vsel %vm133_vm0, %v766_v4, 0.0  ;;  %v2692_v55 = vsel %vm322_vm1, %v954_v52, 0.0  ;;  %v897_v4 = vmul.f32 %v2698_v20, %v2428_v3 }
 0x1ff   :  { %v2554_v16 = vsel %vm116_vm2, %v749_v38, 0.0 }
 0x200   :  { %v765_v24 = vrot.slane %v2554_v16, 7  ;;  %v953_v28 = vrot.slane %v2554_v16, 1 }
 0x201   :  { %867 = vrot.lane.b32.xlu1 %v2456_v29, %s1671_s5 }
 0x202   :  { %v2565_v45 = vsel %vm133_vm0, %v765_v24, 0.0  ;;  %v2647_v0 = vsel %vm322_vm1, %v953_v28, 0.0  ;;  %v815_v28 = vmul.f32 %v2639_v41, %v2512_v12 }
 0x203   :  { %833 = vrot.lane.b32.xlu2 %v2473_v10, %s1672_s7  ;;  %837 = vrot.lane.b32.xlu0 %v2506_v14, %s1672_s7  ;;  %v951_v10 = vrot.slane %v2486_v35, 1 }
 0x205   :  { %v2664_v31 = vsel %vm322_vm1, %v951_v10, 0.0 }
 0x209   :  { %869 = vrot.lane.b32.xlu1 %v2486_v35, %s1671_s5 }
 0x20b   :  { %787 = vrot.lane.b32.xlu2 %v2565_v45, %s1671_s5  ;;  %865 = vrot.lane.b32.xlu0 %v2531_v30, %s1671_s5 }
 0x211   :  { %913 = vrot.lane.b32.xlu1 %v2428_v3, %s1672_s7 }
 0x213   :  { %789 = vrot.lane.b32.xlu2 %v2580_v56, %s1671_s5  ;;  %871 = vrot.lane.b32.xlu0 %v2494_v44, %s1671_s5 }
 0x219   :  { %875 = vrot.lane.b32.xlu1 %v2569_v40, %s1671_s5 }
 0x21b   :  { %839 = vrot.lane.b32.xlu2 %v2565_v45, %s1672_s7  ;;  %873 = vrot.lane.b32.xlu0 %v2554_v16, %s1671_s5 }
 0x221   :  { %965 = vrot.lane.b32.xlu1 %v2596_v33, %s1671_s5 }
 0x223   :  { %841 = vrot.lane.b32.xlu2 %v2580_v56, %s1672_s7  ;;  %963 = vrot.lane.b32.xlu0 %v2602_v47, %s1671_s5 }
 0x229   :  { %923 = vrot.lane.b32.xlu1 %v2494_v44, %s1672_s7 }
 0x22b   :  { %915 = vrot.lane.b32.xlu2 %v2433_v51, %s1672_s7  ;;  %921 = vrot.lane.b32.xlu0 %v2486_v35, %s1672_s7 }
 0x231   :  { %967 = vrot.lane.b32.xlu1 %v2617_v58, %s1671_s5 }
 0x233   :  { %919 = vrot.lane.b32.xlu2 %v2456_v29, %s1672_s7  ;;  %925 = vrot.lane.b32.xlu0 %v2554_v16, %s1672_s7 }
 0x239   :  { %973 = vrot.lane.b32.xlu1 %v2628_v13, %s1671_s5 }
 0x23b   :  { %917 = vrot.lane.b32.xlu2 %v2531_v30, %s1672_s7  ;;  %927 = vrot.lane.b32.xlu0 %v2569_v40, %s1672_s7 }
 0x23e   :  { %v782_v49 = vpop.permute.xlu2 %781 }
 0x23f   :  { %v796_v23 = vmul.f32 %v2636_v15, %v782_v49 }
 0x241   :  { %v822_v21 = vadd.f32 %v814_v53, %v796_v23  ;;  %975 = vrot.lane.b32.xlu1 %v2647_v0, %s1671_s5  ;;  %v816_v53 = vmul.f32 %v2639_v41, %v2506_v14  ;;  %v818_v14 = vmul.f32 %v2639_v41, %v2580_v56 }
 0x243   :  { %969 = vrot.lane.b32.xlu2 %v2653_v22, %s1671_s5  ;;  %1017 = vrot.lane.b32.xlu0 %v2596_v33, %s1672_s7 }
 0x249   :  { %1019 = vrot.lane.b32.xlu1 %v2617_v58, %s1672_s7 }
 0x24a   :  { %v862_v11 = vpop.permute.xlu0 %861 }
 0x24b   :  { %v864_v37 = vpop.permute.xlu1 %863  ;;  %971 = vrot.lane.b32.xlu2 %v2664_v31, %s1671_s5  ;;  %1021 = vrot.lane.b32.xlu0 %v2653_v22, %s1672_s7  ;;  %v879_v63 = vmul.f32 %v2688_v1, %v862_v11 }
 0x24c   :  { %v880_v48 = vmul.f32 %v2688_v1, %v864_v37 }
 0x251   :  { %1027 = vrot.lane.b32.xlu1 %v2647_v0, %s1672_s7 }
 0x252   :  { %v776_v2 = vpop.permute.xlu0 %775 }
 0x253   :  { %v778_v34 = vpop.permute.xlu1 %777  ;;  %v793_v46 = vmul.f32 %v2636_v15, %v776_v2  ;;  %1015 = vrot.lane.b32.xlu2 %v2602_v47, %s1672_s7  ;;  %1025 = vrot.lane.b32.xlu0 %v2628_v13, %s1672_s7 }
 0x254   :  { %v794_v17 = vmul.f32 %v2636_v15, %v778_v34 }
 0x255   :  { %v819_v9 = vadd.f32 %v811_v6, %v793_v46  ;;  %v780_v43 = vpop.permute.xlu2 %779 }
 0x256   :  { %v820_v59 = vadd.f32 %v812_v26, %v794_v17  ;;  %v795_v25 = vmul.f32 %v2636_v15, %v780_v43 }
 0x258   :  { %v821_v42 = vadd.f32 %v813_v60, %v795_v25 }
 0x25a   :  { %v828_v50 = vpop.permute.xlu0 %827 }
 0x25b   :  { %v830_v7 = vpop.permute.xlu1 %829  ;;  %v845_v57 = vmul.f32 %v2686_v18, %v828_v50  ;;  %977 = vrot.lane.b32.xlu2 %v2692_v55, %s1671_s5  ;;  %s2771_s5 = sld [smem:[#allocation14 + $0x82]] }
 0x25c   :  { %v846_v19 = vmul.f32 %v2686_v18, %v830_v7 }
 0x25d   :  { %v853_v5 = vadd.f32 %v845_v57, %v819_v9  ;;  %v834_v38 = vpop.permute.xlu2 %833 }
 0x25e   :  { %v854_v24 = vadd.f32 %v846_v19, %v820_v59  ;;  %v848_v8 = vmul.f32 %v2686_v18, %v834_v38  ;;  %v1265_v38 = vld [vmem:[#allocation15 + $0x178] sm:$0xff] }
 0x25f   :  { %v887_v54 = vadd.f32 %v879_v63, %v853_v5  ;;  %v1233_v63 = vld [vmem:[#allocation15 + $0x78] sm:$0xff]  ;;  %1390 = vmatpush.msra.mxu2 %v1265_v38  ;;  %v1258_v38 = vld [vmem:[#allocation15 + $0x140] sm:$0xff] }
 0x260   :  { %v2705_v39 = vadd.f32 %v880_v48, %v854_v24  ;;  %v856_v61 = vadd.f32 %v848_v8, %v822_v21  ;;  %v817_v21 = vmul.f32 %v2639_v41, %v2565_v45  ;;  %v1249_v5 = vld [vmem:[#allocation15 + $0xf8] sm:$0xff]  ;;  %1350 = vmatpush.msra.mxu0 %v1233_v63  ;;  %v1232_v24 = vld [vmem:[#allocation15 + $0x70] sm:$0xff]  ;;  %v1275_v63 = vld [vmem:[#allocation15 + $0x1c8] sm:$0xff] }
 0x261   :  { %v2707_v32 = vadd.f32 %v897_v4, %v887_v54  ;;  %1370 = vmatpush.msra.mxu1 %v1249_v5  ;;  %v1281_v48 = vld [vmem:[#allocation15 + $0x1f8] sm:$0xff]  ;;  %v1248_v8 = vld [vmem:[#allocation15 + $0xf0] sm:$0xff] }
 0x262   :  { %v784_v62 = vpop.permute.xlu0 %783  ;;  %1410 = vmatpush.msra.mxu3 %v1281_v48  ;;  %v1264_v54 = vld [vmem:[#allocation15 + $0x170] sm:$0xff]  ;;  %1351 = vmatpush.msra.mxu0 %v1232_v24  ;;  %v1274_v48 = vld [vmem:[#allocation15 + $0x1c0] sm:$0xff] }
 0x263   :  { %v786_v49 = vpop.permute.xlu1 %785  ;;  %v797_v36 = vmul.f32 %v2636_v15, %v784_v62  ;;  %1023 = vrot.lane.b32.xlu2 %v2664_v31, %s1672_s7  ;;  %1371 = vmatpush.msra.mxu1 %v1248_v8  ;;  %v1280_v4 = vld [vmem:[#allocation15 + $0x1f0] sm:$0xff]  ;;  %v1247_v62 = vld [vmem:[#allocation15 + $0xe8] sm:$0xff] }
 0x264   :  { %v798_v3 = vmul.f32 %v2636_v15, %v786_v49  ;;  %1391 = vmatpush.msra.mxu2 %v1264_v54  ;;  %1411 = vmatpush.msra.mxu3 %v1280_v4  ;;  %v1279_v49 = vld [vmem:[#allocation15 + $0x1e8] sm:$0xff]  ;;  %v1225_v4 = vld [vmem:[#allocation15 + $0x38] sm:$0xff] }
 0x265   :  { %v823_v23 = vadd.f32 %v815_v28, %v797_v36  ;;  %v788_v10 = vpop.permute.xlu2 %787  ;;  %v1263_v28 = vld [vmem:[#allocation15 + $0x168] sm:$0xff]  ;;  %v1230_v36 = vld [vmem:[#allocation15 + $0x60] sm:$0xff]  ;;  %1372 = vmatpush.msra.mxu1 %v1247_v62  ;;  %v1257_v62 = vld [vmem:[#allocation15 + $0x138] sm:$0xff] }
 0x266   :  { %v824_v11 = vadd.f32 %v816_v53, %v798_v3  ;;  %v799_v37 = vmul.f32 %v2636_v15, %v788_v10  ;;  %v1246_v3 = vld [vmem:[#allocation15 + $0xe0] sm:$0xff]  ;;  %1392 = vmatpush.msra.mxu2 %v1263_v28  ;;  %1412 = vmatpush.msra.mxu3 %v1279_v49  ;;  %v1273_v28 = vld [vmem:[#allocation15 + $0x1b8] sm:$0xff] }
 0x267   :  { %v1278_v10 = vld [vmem:[#allocation15 + $0x1e0] sm:$0xff]  ;;  %1373 = vmatpush.msra.mxu1 %v1246_v3 }
 0x268   :  { %v825_v12 = vadd.f32 %v817_v21, %v799_v37  ;;  %1413 = vmatpush.msra.mxu3 %v1278_v10  ;;  %v1240_v10 = vld [vmem:[#allocation15 + $0xb0] sm:$0xff] }
 0x26b   :  { %v836_v2 = vpop.permute.xlu1 %835  ;;  %1029 = vrot.lane.b32.xlu2 %v2692_v55, %s1672_s7  ;;  %s2773_s7 = sld [smem:[#allocation14 + $0x101]] }
 0x26c   :  { %v849_v6 = vmul.f32 %v2686_v18, %v836_v2  ;;  %v1245_v2 = vld [vmem:[#allocation15 + $0xd8] sm:$0xff] }
 0x26d   :  { %v790_v34 = vpop.permute.xlu2 %789  ;;  %v832_v46 = vpop.permute.xlu0 %831  ;;  %1374 = vmatpush.msra.mxu1 %v1245_v2  ;;  %v1223_v2 = vld [vmem:[#allocation15 + $0x28] sm:$0xff] }
 0x26e   :  { %v2725_v26 = vadd.f32 %v849_v6, %v823_v23  ;;  %v800_v17 = vmul.f32 %v2636_v15, %v790_v34  ;;  %v847_v45 = vmul.f32 %v2686_v18, %v832_v46  ;;  %v1262_v23 = vld [vmem:[#allocation15 + $0x160] sm:$0xff]  ;;  %v1261_v6 = vld [vmem:[#allocation15 + $0x158] sm:$0xff] }
 0x26f   :  { %1393 = vmatpush.msra.mxu2 %v1262_v23  ;;  %v1277_v34 = vld [vmem:[#allocation15 + $0x1d8] sm:$0xff]  ;;  %v1224_v23 = vld [vmem:[#allocation15 + $0x30] sm:$0xff] }
 0x270   :  { %v2729_v9 = vadd.f32 %v818_v14, %v800_v17  ;;  %v2731_v43 = vadd.f32 %v847_v45, %v821_v42  ;;  %v902_v14 = vmul.f32 %v2698_v20, %v2494_v44  ;;  %1414 = vmatpush.msra.mxu3 %v1277_v34  ;;  %v1228_v17 = vld [vmem:[#allocation15 + $0x50] sm:$0xff]  ;;  %v1242_v44 = vld [vmem:[#allocation15 + $0xc0] sm:$0xff] }
 0x271   :  { %1394 = vmatpush.msra.mxu2 %v1261_v6  ;;  %v1244_v45 = vld [vmem:[#allocation15 + $0xd0] sm:$0xff]  ;;  %v1239_v6 = vld [vmem:[#allocation15 + $0xa8] sm:$0xff] }
 0x272   :  { %1375 = vmatpush.msra.mxu1 %v1244_v45  ;;  %v1254_v45 = vld [vmem:[#allocation15 + $0x120] sm:$0xff] }
 0x273   :  { %v868_v60 = vpop.permute.xlu1 %867 }
 0x274   :  { %v882_v59 = vmul.f32 %v2688_v1, %v868_v60  ;;  %v1260_v60 = vld [vmem:[#allocation15 + $0x150] sm:$0xff] }
 0x275   :  { %v840_v25 = vpop.permute.xlu2 %839  ;;  %v838_v52 = vpop.permute.xlu0 %837  ;;  %1395 = vmatpush.msra.mxu2 %v1260_v60  ;;  %v1270_v60 = vld [vmem:[#allocation15 + $0x1a0] sm:$0xff] }
 0x276   :  { %v2734_v50 = vadd.f32 %v882_v59, %v856_v61  ;;  %v851_v7 = vmul.f32 %v2686_v18, %v840_v25  ;;  %v850_v56 = vmul.f32 %v2686_v18, %v838_v52  ;;  %v1231_v61 = vld [vmem:[#allocation15 + $0x68] sm:$0xff]  ;;  %v1276_v59 = vld [vmem:[#allocation15 + $0x1d0] sm:$0xff] }
 0x277   :  { %1352 = vmatpush.msra.mxu0 %v1231_v61  ;;  %v1227_v25 = vld [vmem:[#allocation15 + $0x48] sm:$0xff]  ;;  %1415 = vmatpush.msra.mxu3 %v1276_v59  ;;  %v1241_v61 = vld [vmem:[#allocation15 + $0xb8] sm:$0xff] }
 0x278   :  { %v2738_v41 = vadd.f32 %v851_v7, %v825_v12  ;;  %v858_v15 = vadd.f32 %v850_v56, %v824_v11  ;;  %v1229_v12 = vld [vmem:[#allocation15 + $0x58] sm:$0xff]  ;;  %v1243_v52 = vld [vmem:[#allocation15 + $0xc8] sm:$0xff] }
 0x279   :  { %1353 = vmatpush.msra.mxu0 %v1230_v36  ;;  %v1259_v56 = vld [vmem:[#allocation15 + $0x148] sm:$0xff]  ;;  %1376 = vmatpush.msra.mxu1 %v1243_v52  ;;  %v903_v36 = vmul.f32 %v2698_v20, %v2554_v16  ;;  %v1221_v59 = vld [vmem:[#allocation15 + $0x18] sm:$0xff] }
 0x27a   :  { %1396 = vmatpush.msra.mxu2 %v1259_v56  ;;  %1416 = vmatpush.msra.mxu3 %v1275_v63  ;;  %v1253_v52 = vld [vmem:[#allocation15 + $0x118] sm:$0xff]  ;;  %v1220_v63 = vld [vmem:[#allocation15 + $0x10] sm:$0xff] }
 0x27b   :  { %v2740_v57 = vpop.permute.xlu1 %869  ;;  %1354 = vmatpush.msra.mxu0 %v1229_v12  ;;  %1377 = vmatpush.msra.mxu1 %v1242_v44  ;;  %v1272_v12 = vld [vmem:[#allocation15 + $0x1b0] sm:$0xff]  ;;  %v1269_v56 = vld [vmem:[#allocation15 + $0x198] sm:$0xff] }
 0x27c   :  { %1397 = vmatpush.msra.mxu2 %v1258_v38  ;;  %1417 = vmatpush.msra.mxu3 %v1274_v48  ;;  %v1252_v44 = vld [vmem:[#allocation15 + $0x110] sm:$0xff] }
 0x27d   :  { %v2742_v19 = vpop.permute.xlu2 %841  ;;  %v2744_v42 = vpop.permute.xlu0 %865  ;;  %1355 = vmatpush.msra.mxu0 %v1228_v17  ;;  %1378 = vmatpush.msra.mxu1 %v1241_v61  ;;  %v1238_v17 = vld [vmem:[#allocation15 + $0xa0] sm:$0xff]  ;;  %v1268_v48 = vld [vmem:[#allocation15 + $0x190] sm:$0xff] }
 0x27e   :  { %1398 = vmatpush.msra.mxu2 %v1257_v62  ;;  %1418 = vmatpush.msra.mxu3 %v1273_v28  ;;  %v1267_v28 = vld [vmem:[#allocation15 + $0x188] sm:$0xff] }
 0x27f   :  { %1356 = vmatpush.msra.mxu0 %v1227_v25  ;;  %1379 = vmatpush.msra.mxu1 %v1240_v10  ;;  %v1237_v25 = vld [vmem:[#allocation15 + $0x98] sm:$0xff]  ;;  %v1266_v10 = vld [vmem:[#allocation15 + $0x180] sm:$0xff] }
 0x280   :  { %1419 = vmatpush.msra.mxu3 %v1272_v12  ;;  %v1313_v12 = vld [vmem:[#allocation15 + $0x2f8] sm:$0xff] }
 0x281   :  { %1380 = vmatpush.msra.mxu1 %v1239_v6  ;;  %v2784_v6 = vstv %s2771_s5 }
 0x283   :  { %v2746_v53 = vpop.permute.xlu1 %913  ;;  %1381 = vmatpush.msra.mxu1 %v1238_v17  ;;  %v1312_v17 = vld [vmem:[#allocation15 + $0x2f0] sm:$0xff] }
 0x285   :  { %v2748_v21 = vpop.permute.xlu2 %915  ;;  %v872_v11 = vpop.permute.xlu0 %871  ;;  %1382 = vmatpush.msra.mxu1 %v1237_v25  ;;  %v931_v25 = vmul.f32 %v2784_v6, %v2746_v53  ;;  %v2808_v53 = vstv %s2777_s22 }
 0x286   :  { %v884_v37 = vmul.f32 %v2688_v1, %v872_v11  ;;  %v1256_v11 = vld [vmem:[#allocation15 + $0x130] sm:$0xff] }
 0x287   :  { %1399 = vmatpush.msra.mxu2 %v1256_v11  ;;  %v1297_v11 = vld [vmem:[#allocation15 + $0x278] sm:$0xff] }
 0x288   :  { %v892_v46 = vadd.f32 %v884_v37, %v858_v15  ;;  %v1226_v15 = vld [vmem:[#allocation15 + $0x40] sm:$0xff] }
 0x289   :  { %1357 = vmatpush.msra.mxu0 %v1226_v15  ;;  %v1236_v15 = vld [vmem:[#allocation15 + $0x90] sm:$0xff] }
 0x28a   :  { %v2753_v7 = vadd.f32 %v902_v14, %v892_v46  ;;  %v1271_v46 = vld [vmem:[#allocation15 + $0x1a8] sm:$0xff]  ;;  %v1222_v14 = vld [vmem:[#allocation15 + $0x20] sm:$0xff]  ;;  %1383 = vmatpush.msra.mxu1 %v1236_v15 }
 0x28b   :  { %v2755_v5 = vpop.permute.xlu1 %875  ;;  %1358 = vmatpush.msra.mxu0 %v1225_v4  ;;  %1420 = vmatpush.msra.mxu3 %v1271_v46  ;;  %v1251_v4 = vld [vmem:[#allocation15 + $0x108] sm:$0xff]  ;;  %v2787_v46 = vstv %s2773_s7 }
 0x28c   :  { %v1327_v15 = vld [vmem:[#allocation15 + $0x368] sm:$0xff] }
 0x28d   :  { %v2757_v24 = vpop.permute.xlu2 %919  ;;  %v874_v8 = vpop.permute.xlu0 %873  ;;  %1359 = vmatpush.msra.mxu0 %v1224_v23  ;;  %1421 = vmatpush.msra.mxu3 %v1270_v60  ;;  %v1250_v23 = vld [vmem:[#allocation15 + $0x100] sm:$0xff]  ;;  %v1344_v60 = vld [vmem:[#allocation15 + $0x3f0] sm:$0xff] }
 0x28e   :  { %v885_v54 = vmul.f32 %v2688_v1, %v874_v8  ;;  %v1219_v8 = vld [vmem:[#allocation15 + $0x8] sm:$0xff] }
 0x28f   :  { %1360 = vmatpush.msra.mxu0 %v1223_v2  ;;  %1422 = vmatpush.msra.mxu3 %v1269_v56  ;;  %v1329_v2 = vld [vmem:[#allocation15 + $0x378] sm:$0xff]  ;;  %v1295_v56 = vld [vmem:[#allocation15 + $0x268] sm:$0xff] }
 0x290   :  { %v893_v49 = vadd.f32 %v885_v54, %v2738_v41  ;;  %v1255_v41 = vld [vmem:[#allocation15 + $0x128] sm:$0xff] }
 0x291   :  { %1400 = vmatpush.msra.mxu2 %v1255_v41  ;;  %1361 = vmatpush.msra.mxu0 %v1222_v14  ;;  %v1235_v54 = vld [vmem:[#allocation15 + $0x88] sm:$0xff]  ;;  %v1345_v41 = vld [vmem:[#allocation15 + $0x3f8] sm:$0xff]  ;;  %v1296_v14 = vld [vmem:[#allocation15 + $0x270] sm:$0xff] }
 0x292   :  { %v2763_v3 = vadd.f32 %v903_v36, %v893_v49  ;;  %1423 = vmatpush.msra.mxu3 %v1268_v48  ;;  %1384 = vmatpush.msra.mxu1 %v1235_v54  ;;  %v1218_v49 = vld [vmem:[#allocation15] sm:$0xff]  ;;  %v2803_v48 = vmul.f32 %v2787_v46, %v2602_v47 }
 0x293   :  { %v2765_v37 = vpop.permute.xlu1 %965  ;;  %1401 = vmatpush.msra.mxu2 %v1254_v45  ;;  %1362 = vmatpush.msra.mxu0 %v1221_v59  ;;  %v1234_v36 = vld [vmem:[#allocation15 + $0x80] sm:$0xff]  ;;  %v1328_v45 = vld [vmem:[#allocation15 + $0x370] sm:$0xff]  ;;  %v883_v59 = vmul.f32 %v2688_v1, %v2740_v57  ;;  %v881_v57 = vmul.f32 %v2688_v1, %v2744_v42 }
 0x294   :  { %1424 = vmatpush.msra.mxu3 %v1267_v28  ;;  %1385 = vmatpush.msra.mxu1 %v1234_v36  ;;  %v1294_v54 = vld [vmem:[#allocation15 + $0x260] sm:$0xff]  ;;  %v898_v28 = vmul.f32 %v2698_v20, %v2433_v51  ;;  %v2826_v51 = vmul.f32 %v2787_v46, %v2664_v31  ;;  %v2836_v31 = vmul.f32 %v2787_v46, %v2628_v13  ;;  %v1292_v13 = vld [vmem:[#allocation15 + $0x250] sm:$0xff] }
 0x295   :  { %v2767_v34 = vpop.permute.xlu2 %917  ;;  %v2769_v16 = vpop.permute.xlu0 %963  ;;  %1402 = vmatpush.msra.mxu2 %v1253_v52  ;;  %1363 = vmatpush.msra.mxu0 %v1220_v63  ;;  %v1311_v63 = vld [vmem:[#allocation15 + $0x2e8] sm:$0xff]  ;;  %v1326_v42 = vld [vmem:[#allocation15 + $0x360] sm:$0xff] }
 0x296   :  { %1425 = vmatpush.msra.mxu3 %v1266_v10  ;;  %1450 = vmatpush.msrb.mxu1 %v1313_v12  ;;  %v981_v47 = vmul.f32 %v2808_v53, %v2769_v16  ;;  %v2822_v10 = vmul.f32 %v2787_v46, %v2653_v22  ;;  %v891_v16 = vadd.f32 %v883_v59, %v2725_v26  ;;  %v1293_v22 = vld [vmem:[#allocation15 + $0x258] sm:$0xff] }
 0x297   :  { %1403 = vmatpush.msra.mxu2 %v1252_v44  ;;  %1364 = vmatpush.msra.mxu0 %v1219_v8  ;;  %v2799_v44 = vmul.f32 %v2787_v46, %v2596_v33  ;;  %v1343_v8 = vld [vmem:[#allocation15 + $0x3e8] sm:$0xff]  ;;  %v900_v33 = vmul.f32 %v2698_v20, %v2456_v29  ;;  %v901_v29 = vmul.f32 %v2698_v20, %v2486_v35 }
 0x298   :  { %1490 = vmatpush.msrb.mxu3 %v1345_v41  ;;  %1451 = vmatpush.msrb.mxu1 %v1312_v17  ;;  %v939_v12 = vadd.f32 %v931_v25, %v2707_v32  ;;  %v1325_v41 = vld [vmem:[#allocation15 + $0x358] sm:$0xff]  ;;  %v889_v35 = vadd.f32 %v881_v57, %v2731_v43  ;;  %v2845_v32 = vmul.f32 %v2787_v46, %v2692_v55  ;;  %v1308_v43 = vld [vmem:[#allocation15 + $0x2d0] sm:$0xff] }
 0x299   :  { %1404 = vmatpush.msra.mxu2 %v1251_v4  ;;  %1365 = vmatpush.msra.mxu0 %v1218_v49  ;;  %v1310_v4 = vld [vmem:[#allocation15 + $0x2e0] sm:$0xff]  ;;  %v932_v26 = vmul.f32 %v2784_v6, %v2748_v21  ;;  %v1324_v17 = vld [vmem:[#allocation15 + $0x350] sm:$0xff]  ;;  %v886_v21 = vmul.f32 %v2688_v1, %v2755_v5  ;;  %v909_v25 = vadd.f32 %v901_v29, %v891_v16  ;;  %v1289_v29 = vld [vmem:[#allocation15 + $0x238] sm:$0xff] }
 0x29a   :  { %1491 = vmatpush.msrb.mxu3 %v1344_v60  ;;  %1452 = vmatpush.msrb.mxu1 %v1311_v63  ;;  %v899_v60 = vmul.f32 %v2698_v20, %v2531_v30  ;;  %v1340_v55 = vld [vmem:[#allocation15 + $0x3d0] sm:$0xff]  ;;  %v2857_v63 = vstv %s2795_s23  ;;  %v934_v30 = vmul.f32 %v2784_v6, %v2757_v24  ;;  %v1290_v1 = vld [vmem:[#allocation15 + $0x240] sm:$0xff] }
 0x29b   :  { %v2775_v38 = vpop.permute.xlu1 %923  ;;  %1405 = vmatpush.msra.mxu2 %v1250_v23  ;;  %1430 = vmatpush.msrb.mxu0 %v1297_v11  ;;  %v1342_v23 = vld [vmem:[#allocation15 + $0x3e0] sm:$0xff]  ;;  %v852_v11 = vmul.f32 %v2686_v18, %v2742_v19  ;;  %v1341_v18 = vld [vmem:[#allocation15 + $0x3d8] sm:$0xff]  ;;  %v989_v19 = vadd.f32 %v981_v47, %v939_v12 }
 0x29c   :  { %1492 = vmatpush.msrb.mxu3 %v1343_v8  ;;  %1453 = vmatpush.msrb.mxu1 %v1310_v4  ;;  %v907_v57 = vadd.f32 %v899_v60, %v889_v35  ;;  %v1306_v5 = vld [vmem:[#allocation15 + $0x2c0] sm:$0xff]  ;;  %v1321_v12 = vld [vmem:[#allocation15 + $0x338] sm:$0xff]  ;;  %v1288_v35 = vld [vmem:[#allocation15 + $0x230] sm:$0xff] }
 0x29d   :  { %v2779_v61 = vpop.permute.xlu2 %969  ;;  %v2781_v62 = vpop.permute.xlu0 %921  ;;  %1470 = vmatpush.msrb.mxu2 %v1329_v2  ;;  %1431 = vmatpush.msrb.mxu0 %v1296_v14  ;;  %v1309_v2 = vld [vmem:[#allocation15 + $0x2d8] sm:$0xff]  ;;  %v2841_v14 = vmul.f32 %v2698_v20, %v2569_v40  ;;  %v906_v40 = vadd.f32 %v898_v28, %v2705_v39  ;;  %v860_v59 = vadd.f32 %v852_v11, %v2729_v9  ;;  %v1291_v39 = vld [vmem:[#allocation15 + $0x248] sm:$0xff]  ;;  %v1322_v24 = vld [vmem:[#allocation15 + $0x340] sm:$0xff] }
 0x29e   :  { %1493 = vmatpush.msrb.mxu3 %v1342_v23  ;;  %1454 = vmatpush.msrb.mxu1 %v1309_v2  ;;  %v982_v20 = vmul.f32 %v2808_v53, %v2765_v37  ;;  %v1339_v9 = vld [vmem:[#allocation15 + $0x3c8] sm:$0xff]  ;;  %v1007_v28 = vadd.f32 %v2803_v48, %v989_v19  ;;  %v1338_v47 = vld [vmem:[#allocation15 + $0x3c0] sm:$0xff]  ;;  %v936_v37 = vmul.f32 %v2784_v6, %v2775_v38  ;;  %v1337_v38 = vld [vmem:[#allocation15 + $0x3b8] sm:$0xff] }
 0x29f   :  { %1471 = vmatpush.msrb.mxu2 %v1328_v45  ;;  %1432 = vmatpush.msrb.mxu0 %v1295_v56  ;;  %v908_v45 = vadd.f32 %v900_v33, %v2734_v50  ;;  %v1323_v50 = vld [vmem:[#allocation15 + $0x348] sm:$0xff]  ;;  %v940_v8 = vadd.f32 %v932_v26, %v906_v40  ;;  %v894_v16 = vadd.f32 %v886_v21, %v860_v59  ;;  %v1320_v19 = vld [vmem:[#allocation15 + $0x330] sm:$0xff] }
 0x2a0   :  { %1494 = vmatpush.msrb.mxu3 %v1341_v18  ;;  %1455 = vmatpush.msrb.mxu1 %v1308_v43  ;;  %v935_v48 = vmul.f32 %v2784_v6, %v2781_v62  ;;  %v1304_v18 = vld [vmem:[#allocation15 + $0x2b0] sm:$0xff]  ;;  %v944_v43 = vadd.f32 %v936_v37, %v2753_v7  ;;  %v1303_v60 = vld [vmem:[#allocation15 + $0x2a8] sm:$0xff]  ;;  %v1001_v7 = vmul.f32 %v2787_v46, %v2617_v58  ;;  %v1334_v58 = vld [vmem:[#allocation15 + $0x3a0] sm:$0xff] }
 0x2a1   :  { %1472 = vmatpush.msrb.mxu2 %v1327_v15  ;;  %1433 = vmatpush.msrb.mxu0 %v1294_v54  ;;  %v1307_v15 = vld [vmem:[#allocation15 + $0x2c8] sm:$0xff]  ;;  %v933_v54 = vmul.f32 %v2784_v6, %v2767_v34  ;;  %v1305_v34 = vld [vmem:[#allocation15 + $0x2b8] sm:$0xff]  ;;  %v990_v2 = vadd.f32 %v982_v20, %v940_v8 }
 0x2a2   :  { %1495 = vmatpush.msrb.mxu3 %v1340_v55  ;;  %1456 = vmatpush.msrb.mxu1 %v1307_v15  ;;  %v943_v55 = vadd.f32 %v935_v48, %v909_v25  ;;  %v2891_v15 = vmul.f32 %v2787_v46, %v2647_v0  ;;  %v1286_v25 = vld [vmem:[#allocation15 + $0x220] sm:$0xff]  ;;  %v1332_v48 = vld [vmem:[#allocation15 + $0x390] sm:$0xff] }
 0x2a3   :  { %v2793_v52 = vpop.permute.xlu1 %967  ;;  %1473 = vmatpush.msrb.mxu2 %v1326_v42  ;;  %1434 = vmatpush.msrb.mxu0 %v1293_v22  ;;  %v984_v42 = vmul.f32 %v2808_v53, %v2779_v61  ;;  %v942_v22 = vadd.f32 %v934_v30, %v908_v45  ;;  %v2878_v61 = vstv %s3104_s6  ;;  %v941_v62 = vadd.f32 %v933_v54, %v907_v57  ;;  %v1287_v45 = vld [vmem:[#allocation15 + $0x228] sm:$0xff]  ;;  %v1285_v54 = vld [vmem:[#allocation15 + $0x218] sm:$0xff] }
 0x2a4   :  { %1496 = vmatpush.msrb.mxu3 %v1339_v9  ;;  %v983_v11 = vmul.f32 %v2808_v53, %v2793_v52  ;;  %1457 = vmatpush.msrb.mxu1 %v1306_v5  ;;  %v1318_v5 = vld [vmem:[#allocation15 + $0x320] sm:$0xff]  ;;  %v1008_v0 = vadd.f32 %v2799_v44, %v990_v2  ;;  %v1333_v44 = vld [vmem:[#allocation15 + $0x398] sm:$0xff] }
 0x2a5   :  { %v2816_v49 = vpop.permute.xlu2 %971  ;;  %v2818_v36 = vpop.permute.xlu0 %925  ;;  %1474 = vmatpush.msrb.mxu2 %v1325_v41  ;;  %1435 = vmatpush.msrb.mxu0 %v1292_v13  ;;  %v1336_v13 = vld [vmem:[#allocation15 + $0x3b0] sm:$0xff] }
 0x2a6   :  { %1497 = vmatpush.msrb.mxu3 %v1338_v47  ;;  %v985_v52 = vmul.f32 %v2808_v53, %v2816_v49  ;;  %1458 = vmatpush.msrb.mxu1 %v1305_v34  ;;  %v937_v40 = vmul.f32 %v2784_v6, %v2818_v36  ;;  %v991_v59 = vadd.f32 %v983_v11, %v941_v62 }
 0x2a7   :  { %1475 = vmatpush.msrb.mxu2 %v1324_v17  ;;  %1436 = vmatpush.msrb.mxu0 %v1291_v39  ;;  %v992_v17 = vadd.f32 %v984_v42, %v942_v22  ;;  %v1335_v39 = vld [vmem:[#allocation15 + $0x3a8] sm:$0xff] }
 0x2a8   :  { %1498 = vmatpush.msrb.mxu3 %v1337_v38  ;;  %1459 = vmatpush.msrb.mxu1 %v1304_v18  ;;  %v993_v30 = vadd.f32 %v985_v52, %v943_v55  ;;  %v945_v8 = vadd.f32 %v937_v40, %v2763_v3  ;;  %v1317_v3 = vld [vmem:[#allocation15 + $0x318] sm:$0xff]  ;;  %v1283_v22 = vld [vmem:[#allocation15 + $0x208] sm:$0xff]  ;;  %v1298_v40 = vld [vmem:[#allocation15 + $0x280] sm:$0xff] }
 0x2a9   :  { %1476 = vmatpush.msrb.mxu2 %v1323_v50  ;;  %1437 = vmatpush.msrb.mxu0 %v1290_v1  ;;  %v1302_v50 = vld [vmem:[#allocation15 + $0x2a0] sm:$0xff] }
 0x2aa   :  { %1499 = vmatpush.msrb.mxu3 %v1336_v13  ;;  %1460 = vmatpush.msrb.mxu1 %v1303_v60 }
 0x2ab   :  { %v974_v56 = vpop.permute.xlu1 %973  ;;  %1477 = vmatpush.msrb.mxu2 %v1322_v24  ;;  %1438 = vmatpush.msrb.mxu0 %v1289_v29  ;;  %v2904_v24 = vadd.f32 %v2822_v10, %v992_v17  ;;  %v1300_v29 = vld [vmem:[#allocation15 + $0x290] sm:$0xff]  ;;  %v1282_v17 = vld [vmem:[#allocation15 + $0x200] sm:$0xff] }
 0x2ac   :  { %v986_v26 = vmul.f32 %v2808_v53, %v974_v56  ;;  %v1319_v56 = vld [vmem:[#allocation15 + $0x328] sm:$0xff]  ;;  %1500 = vmatpush.msrb.mxu3 %v1335_v39  ;;  %1461 = vmatpush.msrb.mxu1 %v1302_v50  ;;  %v1316_v10 = vld [vmem:[#allocation15 + $0x310] sm:$0xff]  ;;  %v1330_v39 = vld [vmem:[#allocation15 + $0x380] sm:$0xff] }
 0x2ad   :  { %v1016_v4 = vpop.permute.xlu2 %1015  ;;  %v928_v33 = vpop.permute.xlu0 %927  ;;  %1478 = vmatpush.msrb.mxu2 %v1321_v12  ;;  %1439 = vmatpush.msrb.mxu0 %v1288_v35 }
 0x2ae   :  { %v1033_v23 = vmul.f32 %v2857_v63, %v1016_v4  ;;  %v994_v20 = vadd.f32 %v986_v26, %v944_v43  ;;  %v938_v57 = vmul.f32 %v2784_v6, %v928_v33  ;;  %v1301_v4 = vld [vmem:[#allocation15 + $0x298] sm:$0xff]  ;;  %v912_v6 = vadd.f32 %v2841_v14, %v894_v16  ;;  %1501 = vmatpush.msrb.mxu3 %v1334_v58 }
 0x2af   :  { %1479 = vmatpush.msrb.mxu2 %v1320_v19  ;;  %1440 = vmatpush.msrb.mxu0 %v1287_v45  ;;  %v1009_v33 = vadd.f32 %v1001_v7, %v991_v59  ;;  %v1011_v14 = vadd.f32 %v2826_v51, %v993_v30  ;;  %v1299_v51 = vld [vmem:[#allocation15 + $0x288] sm:$0xff] }
 0x2b0   :  { %v1041_v41 = vadd.f32 %v1033_v23, %v1007_v28  ;;  %v1284_v23 = vld [vmem:[#allocation15 + $0x210] sm:$0xff]  ;;  %v946_v34 = vadd.f32 %v938_v57, %v912_v6  ;;  %v2909_v16 = vadd.f32 %v2836_v31, %v994_v20  ;;  %1462 = vmatpush.msrb.mxu1 %v1301_v4  ;;  %1502 = vmatpush.msrb.mxu3 %v1333_v44  ;;  %v1315_v31 = vld [vmem:[#allocation15 + $0x308] sm:$0xff] }
 0x2b1   :  { %1480 = vmatpush.msrb.mxu2 %v1319_v56  ;;  %1441 = vmatpush.msrb.mxu0 %v1286_v25  ;;  %v1314_v56 = vld [vmem:[#allocation15 + $0x300] sm:$0xff] }
 0x2b2   :  { %v1051_v49 = vadd.f32 %v2878_v61, %v1041_v41  ;;  %1463 = vmatpush.msrb.mxu1 %v1300_v29  ;;  %v1331_v41 = vld [vmem:[#allocation15 + $0x388] sm:$0xff]  ;;  %1503 = vmatpush.msrb.mxu3 %v1332_v48 }
 0x2b3   :  { %v976_v21 = vpop.permute.xlu1 %975  ;;  %1481 = vmatpush.msrb.mxu2 %v1318_v5  ;;  %1442 = vmatpush.msrb.mxu0 %v1285_v54 }
 0x2b4   :  { %v987_v36 = vmul.f32 %v2808_v53, %v976_v21  ;;  %v2900_v28 = vsel %vm116_vm2, %v1051_v49, 0.0  ;;  %1464 = vmatpush.msrb.mxu1 %v1299_v51  ;;  %1504 = vmatpush.msrb.mxu3 %v1331_v41 }
 0x2b5   :  { %v978_v9 = vpop.permute.xlu2 %977  ;;  %v1018_v1 = vpop.permute.xlu0 %1017  ;;  %v1114_v12 = vrot.slane %v2900_v28, 2  ;;  %v1130_v38 = vrot.slane %v2900_v28, 3  ;;  %1482 = vmatpush.msrb.mxu2 %v1317_v3  ;;  %1443 = vmatpush.msrb.mxu0 %v1284_v23  ;;  %v1146_v35 = vrot.slane %v2900_v28, 4  ;;  %v1162_v18 = vrot.slane %v2900_v28, 5 }
 0x2b6   :  { %v1034_v46 = vmul.f32 %v2857_v63, %v1018_v1  ;;  %v995_v47 = vadd.f32 %v987_v36, %v945_v8  ;;  %v988_v37 = vmul.f32 %v2808_v53, %v978_v9  ;;  %v1098_v53 = vrot.slane %v2900_v28, 1  ;;  %1465 = vmatpush.msrb.mxu1 %v1298_v40  ;;  %1505 = vmatpush.msrb.mxu3 %v1330_v39 }
 0x2b7   :  { %v1178_v62 = vrot.slane %v2900_v28, 6  ;;  %v1194_v52 = vrot.slane %v2900_v28, 7  ;;  %1483 = vmatpush.msrb.mxu2 %v1316_v10  ;;  %1444 = vmatpush.msrb.mxu0 %v1283_v22 }
 0x2b8   :  { %v1042_v42 = vadd.f32 %v1034_v46, %v1008_v0  ;;  %v996_v26 = vadd.f32 %v988_v37, %v946_v34  ;;  %v1013_v43 = vadd.f32 %v2891_v15, %v995_v47 }
 0x2b9   :  { %1484 = vmatpush.msrb.mxu2 %v1315_v31  ;;  %1445 = vmatpush.msrb.mxu0 %v1282_v17 }
 0x2ba   :  { %v1052_v11 = vadd.f32 %v2878_v61, %v1042_v42  ;;  %v1014_v8 = vadd.f32 %v2845_v32, %v996_v26 }
 0x2bb   :  { %v1020_v2 = vpop.permute.xlu1 %1019  ;;  %1485 = vmatpush.msrb.mxu2 %v1314_v56 }
 0x2bc   :  { %v2921_v19 = vsel %vm116_vm2, %v1052_v11, 0.0  ;;  %v1035_v13 = vmul.f32 %v2857_v63, %v1020_v2 }
 0x2bd   :  { %v1024_v45 = vpop.permute.xlu2 %1023  ;;  %v1022_v60 = vpop.permute.xlu0 %1021  ;;  %v1075_v55 = vrot.slane %v2921_v19, 7  ;;  %v1099_v59 = vsel %vm1076_vm3, %v2921_v19, %v1098_v53  ;;  %v1115_v49 = vrot.slane %v2921_v19, 1  ;;  %v1131_v21 = vrot.slane %v2921_v19, 2 }
 0x2be   :  { %v1043_v7 = vadd.f32 %v1035_v13, %v1009_v33  ;;  %v1037_v15 = vmul.f32 %v2857_v63, %v1024_v45  ;;  %v1036_v36 = vmul.f32 %v2857_v63, %v1022_v60  ;;  %v1147_v25 = vrot.slane %v2921_v19, 3 }
 0x2bf   :  { %v1077_v50 = vsel %vm1076_vm3, %v1075_v55, %v2900_v28  ;;  %v1116_v30 = vsel %vm1076_vm3, %v1115_v49, %v1114_v12  ;;  %v1132_v20 = vsel %vm1076_vm3, %v1131_v21, %v1130_v38  ;;  %v1163_v57 = vrot.slane %v2921_v19, 4 }
 0x2c0   :  { %v1053_v9 = vadd.f32 %v2878_v61, %v1043_v7  ;;  %v1045_v1 = vadd.f32 %v1037_v15, %v1011_v14  ;;  %v1044_v5 = vadd.f32 %v1036_v36, %v2904_v24  ;;  %v1179_v58 = vrot.slane %v2921_v19, 5 }
 0x2c1   :  { %v2943_v0 = vsel %vm1076_vm3, %v1147_v25, %v1146_v35  ;;  %v2946_v46 = vsel %vm1076_vm3, %v1163_v57, %v1162_v18  ;;  %v1195_v54 = vrot.slane %v2921_v19, 6 }
 0x2c2   :  { %v2951_v4 = vsel %vm116_vm2, %v1053_v9, 0.0  ;;  %v1055_v6 = vadd.f32 %v2878_v61, %v1045_v1  ;;  %v1054_v33 = vadd.f32 %v2878_v61, %v1044_v5  ;;  %v2956_v24 = vsel %vm1076_vm3, %v1179_v58, %v1178_v62 }
 0x2c3   :  { %v1028_v32 = vpop.permute.xlu1 %1027  ;;  %v1078_v3 = vrot.slane %v2951_v4, 6  ;;  %v1100_v44 = vrot.slane %v2951_v4, 7  ;;  %v1117_v47 = vsel %vm1079_vm4, %v2951_v4, %v1116_v30  ;;  %v1133_v37 = vrot.slane %v2951_v4, 1 }
 0x2c4   :  { %v2965_v42 = vsel %vm116_vm2, %v1055_v6, 0.0  ;;  %v2969_v23 = vsel %vm116_vm2, %v1054_v33, 0.0  ;;  %v1039_v29 = vmul.f32 %v2857_v63, %v1028_v32  ;;  %v1149_v34 = vrot.slane %v2951_v4, 2 }
 0x2c5   :  { %v1030_v14 = vpop.permute.xlu2 %1029  ;;  %v1026_v10 = vpop.permute.xlu0 %1025  ;;  %v1080_v48 = vsel %vm1079_vm4, %v1078_v3, %v1077_v50  ;;  %v1081_v11 = vrot.slane %v2969_v23, 5  ;;  %v1084_v53 = vrot.slane %v2965_v42, 4  ;;  %v1101_v12 = vsel %vm1079_vm4, %v1100_v44, %v1099_v59 }
 0x2c6   :  { %v1047_v38 = vadd.f32 %v1039_v29, %v1013_v43  ;;  %v1040_v22 = vmul.f32 %v2857_v63, %v1030_v14  ;;  %v1038_v51 = vmul.f32 %v2857_v63, %v1026_v10  ;;  %v1102_v2 = vrot.slane %v2969_v23, 6 }
 0x2c7   :  { %v1083_v31 = vsel %vm1082_vm6, %v1081_v11, %v1080_v48  ;;  %v1104_v41 = vrot.slane %v2965_v42, 5  ;;  %v1118_v35 = vrot.slane %v2969_v23, 7  ;;  %v1120_v18 = vrot.slane %v2965_v42, 6 }
 0x2c8   :  { %v1057_v62 = vadd.f32 %v2878_v61, %v1047_v38  ;;  %v1048_v26 = vadd.f32 %v1040_v22, %v1014_v8  ;;  %v1046_v13 = vadd.f32 %v1038_v51, %v2909_v16  ;;  %v1086_v43 = vsel %vm1085_vm5, %v1084_v53, %v1083_v31 }
 0x2c9   :  { %v1103_v63 = vsel %vm1082_vm6, %v1102_v2, %v1101_v12  ;;  %v1119_v17 = vsel %vm1082_vm6, %v1118_v35, %v1117_v47  ;;  %v1134_v40 = vsel %vm1079_vm4, %v1133_v37, %v1132_v20  ;;  %v1136_v45 = vrot.slane %v2965_v42, 7 }
 0x2ca   :  { %v2993_v60 = vsel %vm116_vm2, %v1057_v62, 0.0  ;;  %v1058_v55 = vadd.f32 %v2878_v61, %v1048_v26  ;;  %v1056_v59 = vadd.f32 %v2878_v61, %v1046_v13  ;;  %v1105_v16 = vsel %vm1085_vm5, %v1104_v41, %v1103_v63 }
 0x2cb   :  { %v1090_v49 = vrot.slane %v2993_v60, 2  ;;  %v1108_v21 = vrot.slane %v2993_v60, 3  ;;  %v1121_v56 = vsel %vm1085_vm5, %v1120_v18, %v1119_v17  ;;  %v1124_v39 = vrot.slane %v2993_v60, 4 }
 0x2cc   :  { %v3004_v7 = vsel %vm116_vm2, %v1058_v55, 0.0  ;;  %v3008_v15 = vsel %vm116_vm2, %v1056_v59, 0.0  ;;  %v1135_v61 = vsel %vm1082_vm6, %v2969_v23, %v1134_v40  ;;  %v1140_v36 = vrot.slane %v2993_v60, 5 }
 0x2cd   :  { %v1087_v25 = vrot.slane %v3008_v15, 3  ;;  %v1093_v50 = vrot.slane %v3004_v7, 1  ;;  %v1106_v30 = vrot.slane %v3008_v15, 4  ;;  %v1110_v20 = vrot.slane %v3004_v7, 2 }
 0x2ce   :  { %v1122_v57 = vrot.slane %v3008_v15, 5  ;;  %v1126_v9 = vrot.slane %v3004_v7, 3  ;;  %v1137_v27 = vsel %vm1085_vm5, %v1136_v45, %v1135_v61  ;;  %v1138_v1 = vrot.slane %v3008_v15, 6 }
 0x2cf   :  { %v1089_v5 = vsel %vm1088_vm7, %v1087_v25, %v1086_v43  ;;  %v1107_v58 = vsel %vm1088_vm7, %v1106_v30, %v1105_v16  ;;  %v1142_v8 = vrot.slane %v3004_v7, 4  ;;  %v1150_v6 = vsel %vm1079_vm4, %v1149_v34, %v2943_v0 }
 0x2d0   :  { %v1092_v33 = vsel %vm1091_vm8, %v1090_v49, %v1089_v5  ;;  %v1109_v32 = vsel %vm1091_vm8, %v1108_v21, %v1107_v58  ;;  %v1123_v3 = vsel %vm1088_vm7, %v1122_v57, %v1121_v56  ;;  %v1139_v44 = vsel %vm1088_vm7, %v1138_v1, %v1137_v27 }
 0x2d1   :  { %v1095_v47 = vsel %vm1094_vm9, %v1093_v50, %v1092_v33  ;;  %v1111_v37 = vsel %vm1094_vm9, %v1110_v20, %v1109_v32  ;;  %v1125_v29 = vsel %vm1091_vm8, %v1124_v39, %v1123_v3  ;;  %v1141_v14 = vsel %vm1091_vm8, %v1140_v36, %v1139_v44  ;;  %v1567_v20 = vld [vmem:[%s3106_s8] ss:$0 sm:$0xff] }
 0x2d2   :  { %1366 = vmatmul.f32.vlgmr.msra.gmra.mxu0 %v1095_v47  ;;  %1386 = vmatmul.f32.vlgmr.msra.gmra.mxu1 %v1111_v37  ;;  %v1127_v0 = vsel %vm1094_vm9, %v1126_v9, %v1125_v29  ;;  %v1143_v34 = vsel %vm1094_vm9, %v1142_v8, %v1141_v14  ;;  %v1151_v10 = vrot.slane %v2969_v23, 1  ;;  %v1154_v48 = vrot.slane %v3008_v15, 7  ;;  %v1568_v29 = vld [vmem:[%s3107_s9] ss:$0 sm:$0xff] }
 0x2d3   :  { %1406 = vmatmul.f32.vlgmr.msra.gmra.mxu2 %v1127_v0  ;;  %1426 = vmatmul.f32.vlgmr.msra.gmra.mxu3 %v1143_v34  ;;  %v1156_v11 = vrot.slane %v2993_v60, 6  ;;  %v1158_v53 = vrot.slane %v3004_v7, 5  ;;  %v1165_v12 = vrot.slane %v2951_v4, 3  ;;  %v1167_v38 = vrot.slane %v2969_v23, 2  ;;  %v1569_v34 = vld [vmem:[#allocation6] ss:$0 sm:$0xff] }
 0x2d4   :  { %v1152_v22 = vsel %vm1082_vm6, %v1151_v10, %v1150_v6  ;;  %v1169_v51 = vrot.slane %v2965_v42, 1  ;;  %v1172_v2 = vrot.slane %v2993_v60, 7  ;;  %v1174_v31 = vrot.slane %v3004_v7, 6 }
 0x2d5   :  { %v1153_v41 = vsel %vm1085_vm5, %v2965_v42, %v1152_v22  ;;  %v1166_v35 = vsel %vm1079_vm4, %v1165_v12, %v2946_v46  ;;  %v1181_v18 = vrot.slane %v2951_v4, 4  ;;  %v1183_v62 = vrot.slane %v2969_v23, 3 }
 0x2d6   :  { %v1155_v26 = vsel %vm1088_vm7, %v1154_v48, %v1153_v41  ;;  %v1168_v13 = vsel %vm1082_vm6, %v1167_v38, %v1166_v35  ;;  %v1185_v43 = vrot.slane %v2965_v42, 2  ;;  %v1187_v63 = vrot.slane %v3008_v15, 1 }
 0x2d7   :  { %v1157_v17 = vsel %vm1091_vm8, %v1156_v11, %v1155_v26  ;;  %v1170_v40 = vsel %vm1085_vm5, %v1169_v51, %v1168_v13  ;;  %v1182_v45 = vsel %vm1079_vm4, %v1181_v18, %v2956_v24  ;;  %v1190_v46 = vrot.slane %v3004_v7, 7 }
 0x2d8   :  { %v1159_v55 = vsel %vm1094_vm9, %v1158_v53, %v1157_v17  ;;  %v1171_v59 = vsel %vm1088_vm7, %v3008_v15, %v1170_v40  ;;  %v1184_v16 = vsel %vm1082_vm6, %v1183_v62, %v1182_v45  ;;  %v1196_v49 = vsel %vm1076_vm3, %v1195_v54, %v1194_v52 }
 0x2d9   :  { %v1173_v21 = vsel %vm1091_vm8, %v1172_v2, %v1171_v59  ;;  %v1186_v56 = vsel %vm1085_vm5, %v1185_v43, %v1184_v16  ;;  %v1197_v24 = vrot.slane %v2951_v4, 5  ;;  %v1199_v39 = vrot.slane %v2969_v23, 4 }
 0x2da   :  { %1446 = vmatmul.f32.vlgmr.msrb.gmra.mxu0 %v1159_v55  ;;  %v1175_v61 = vsel %vm1094_vm9, %v1174_v31, %v1173_v21  ;;  %v1188_v36 = vsel %vm1088_vm7, %v1187_v63, %v1186_v56  ;;  %v1201_v25 = vrot.slane %v2965_v42, 3  ;;  %v1203_v28 = vrot.slane %v3008_v15, 2 }
 0x2db   :  { %1466 = vmatmul.f32.vlgmr.msrb.gmra.mxu1 %v1175_v61  ;;  %v1189_v52 = vsel %vm1091_vm8, %v2993_v60, %v1188_v36  ;;  %v1198_v19 = vsel %vm1079_vm4, %v1197_v24, %v1196_v49  ;;  %v1205_v50 = vrot.slane %v2993_v60, 1 }
 0x2dc   :  { %v1191_v54 = vsel %vm1094_vm9, %v1190_v46, %v1189_v52  ;;  %v1200_v4 = vsel %vm1082_vm6, %v1199_v39, %v1198_v19 }
 0x2dd   :  { %1486 = vmatmul.f32.vlgmr.msrb.gmra.mxu2 %v1191_v54  ;;  %v1202_v23 = vsel %vm1085_vm5, %v1201_v25, %v1200_v4 }
 0x2de   :  { %v1204_v30 = vsel %vm1088_vm7, %v1203_v28, %v1202_v23 }
 0x2df   :  { %v1206_v42 = vsel %vm1091_vm8, %v1205_v50, %v1204_v30 }
 0x2e0   :  { %v1207_v15 = vsel %vm1094_vm9, %v3004_v7, %v1206_v42 }
 0x2e1   :  { %1506 = vmatmul.f32.vlgmr.msrb.gmra.mxu3 %v1207_v15 }
 0x34f   :  { %v1367_v57 = vpop.f32.mrf.mxu0  ;;  %v1387_v27 = vpop.f32.mrf.mxu1 }
 0x350   :  { %v1368_v9 = vadd.f32 %v1567_v20, %v1367_v57 }
 0x352   :  { %v1388_v1 = vadd.f32 %v1387_v27, %v1368_v9 }
 0x356   :  { %v1407_v5 = vpop.f32.mrf.mxu2  ;;  %v1427_v8 = vpop.f32.mrf.mxu3 }
 0x357   :  { %v1408_v58 = vadd.f32 %v1407_v5, %v1388_v1  ;;  %v1447_v6 = vpop.f32.mrf.mxu0 }
 0x358   :  { %v1467_v32 = vpop.f32.mrf.mxu1 }
 0x359   :  { %v1428_v60 = vadd.f32 %v1427_v8, %v1408_v58 }
 0x35b   :  { %v1448_v33 = vadd.f32 %v1447_v6, %v1428_v60 }
 0x35d   :  { %v1468_v3 = vadd.f32 %v1467_v32, %v1448_v33 }
 0x360   :  { %v1487_v44 = vpop.f32.mrf.mxu2 }
 0x361   :  { %v1488_v47 = vadd.f32 %v1487_v44, %v1468_v3 }
 0x364   :  { %v1507_v7 = vpop.f32.mrf.mxu3 }
 0x365   :  { %v1508_v37 = vadd.f32 %v1507_v7, %v1488_v47 }
 0x367   :  { %v1510_v14 = vmax.f32 %v1508_v37, 0.0 }
 0x369   :  { %v1515_v0 = vmul.f32 %v1568_v29, %v1510_v14 }
 0x36b   :  { %1516 = vadd.xlane.f32.xlu0 %v1515_v0 }
 0x3de   :  { %v1517_v10 = vpop.xlane.xlu0 %1516 }
 0x3df   :  { %v1522_v48 = vadd.f32 %v1569_v34, %v1517_v10 }
 0x3e1   :  { %1524 = vst.msk [vmem:[%s3109_s11] sm:$0xff] %vm1523_vm10, %v1522_v48 }
 0x3e2   :  { %1529 = vsyncpa [#allocation8], 1 }
 0x3e3   :  { %1530 = vsyncpa [#allocation16], 1 }
 0x3e4   :  { %1531 = vsyncpa [#allocation9], 1 }
 0x3e5   :  { %1532 = vsyncpa [#allocation10], 1 }
 0x3e6   :  { %1533 = vsyncpa [#allocation13], 1 }

</bundles_post_ra>
